<compile_context>
chip_gen: v6e
topology: v6e:2x2x1
jax: 0.10.0
libtpu: 0.0.40
codegen_flags: <defaults>
</compile_context>

<pallas_src>
import functools
import math

import jax
import jax.numpy as jnp
from jax.experimental import pallas as pl
from jax.experimental.pallas import tpu as pltpu

# small synthetic config (hidden divisible by heads; falcon-style multi-query)
HIDDEN = 128
N_HEAD = 4
HEAD_DIM = HIDDEN // N_HEAD      # 32
BATCH = 2
SEQ = 16


# ---------------------------------------------------------------------------
# Fused Pallas kernel: QKV proj -> RoPE -> causal MQA attention -> dense proj
# ---------------------------------------------------------------------------
def _fused_attn_kernel(x_ref, wq_ref, wk_ref, wv_ref, wdt_ref,
                       cq_ref, sq_ref, ck_ref, sk_ref, o_ref,
                       *, B, S, H, D):
    """x:(B*S,Hs) bf16; wq:(H*D,Hs) wk/wv:(D,Hs) wdt=(dense.T):(H*D,Hs) bf16;
    cos/sin q,k:(B*S,D/2) f32 (scale folded into q tables); o:(B*S,Hs) f32."""
    half = D // 2
    Hs = o_ref.shape[1]

    x = x_ref[...]                                        # (B*S, Hs) bf16

    def rproj(w):
        # x @ w.T with bf16 operands, f32 accumulation on the MXU.
        return jax.lax.dot_general(
            x, w, dimension_numbers=(((1,), (1,)), ((), ())),
            preferred_element_type=jnp.float32)

    # ---- shared (multi-query) K / V: computed once per call ----
    # K is projected as its two rotary halves so rotate_half needs no lane
    # concat / roll: the halves stay separate and the score contraction over
    # head_dim is split into two matmuls instead (exact, zero extra FLOPs).
    k1 = rproj(wk_ref[0:half, :])                         # (B*S, half) f32
    k2 = rproj(wk_ref[half:D, :])                         # (B*S, half) f32
    ck = ck_ref[...]
    sk = sk_ref[...]
    kr1 = (k1 * ck - k2 * sk).astype(jnp.bfloat16)        # RoPE'd first half
    kr2 = (k2 * ck + k1 * sk).astype(jnp.bfloat16)        # RoPE'd second half
    v = rproj(wv_ref[...]).astype(jnp.bfloat16)           # (B*S, D)

    # ---- causal mask generated in-kernel, shared across heads & batch ----
    row = jax.lax.broadcasted_iota(jnp.int32, (S, S), 0)
    col = jax.lax.broadcasted_iota(jnp.int32, (S, S), 1)
    neg_bias = jnp.where(row >= col, 0.0, -1e30).astype(jnp.float32)

    cq = cq_ref[...]                                      # (B*S, half), *1/sqrt(D)
    sq = sq_ref[...]

    # ---- per-head loop: weight sublane-slices only, no q relayouts ----
    out = [jnp.zeros((S, Hs), jnp.float32) for _ in range(B)]
    for h in range(H):
        base = h * D
        q1 = rproj(wq_ref[base:base + half, :])           # (B*S, half) f32
        q2 = rproj(wq_ref[base + half:base + D, :])       # (B*S, half) f32
        qr1 = (q1 * cq - q2 * sq).astype(jnp.bfloat16)    # scale folded in cq/sq
        qr2 = (q2 * cq + q1 * sq).astype(jnp.bfloat16)
        wo_h = wdt_ref[base:base + D, :]                  # (D, Hs) bf16, sublane slice

        for b in range(B):
            r0, r1 = b * S, (b + 1) * S
            # scores: contraction over head_dim split into its two RoPE halves
            s_bh = jax.lax.dot_general(
                qr1[r0:r1], kr1[r0:r1],
                dimension_numbers=(((1,), (1,)), ((), ())),
                preferred_element_type=jnp.float32)
            s_bh = s_bh + jax.lax.dot_general(
                qr2[r0:r1], kr2[r0:r1],
                dimension_numbers=(((1,), (1,)), ((), ())),
                preferred_element_type=jnp.float32)
            s_bh = s_bh + neg_bias                        # (S, S) f32

            # numerically stable softmax; stats in f32, reciprocal on the EUP.
            # TODO(synk): at real sizes (head_dim=64, long S) profile the EUP;
            # if exp binds on v6e/v7x evaluate exp in bf16 there.
            m = jnp.max(s_bh, axis=-1, keepdims=True)
            e = jnp.exp(s_bh - m)
            p = e * pl.reciprocal(jnp.sum(e, axis=-1, keepdims=True), approx=True)

            ctx = jnp.dot(p.astype(jnp.bfloat16), v[r0:r1],
                          preferred_element_type=jnp.float32)      # (S, D) f32

            # per-head dense accumulation: no head-merge concat; the output
            # stays lane-dense (Hs = 128 multiple).
            out[b] = out[b] + jnp.dot(ctx.astype(jnp.bfloat16), wo_h,
                                      preferred_element_type=jnp.float32)

    for b in range(B):
        o_ref[b * S:(b + 1) * S, :] = out[b]              # sublane-aligned stores

    # TODO(synk): attention_dropout / hidden_dropout are identity in eval mode;
    # alibi / layer_past / use_cache / head_mask branches are not exercised.
    # TODO(synk): at real Falcon-7B sizes (hidden=4544, H=71, long S) this must
    # become a multi-step grid (query-tile x KV-tile, flash-style online
    # softmax) with 128-class tiles on v5e and 256-class on v6e/v7x, >=4 steps
    # per core, grid-invariant weights either pipeline_mode=pl.Buffered(1) or
    # DMA'd once into scratch, per-step working set <= ~24 MiB for v7x's
    # 64 MiB VMEM, and vmem_limit_bytes set explicitly.


# ---------------------------------------------------------------------------
# Wrapper: trace-time weight split / cast + RoPE table precompute (tiny)
# ---------------------------------------------------------------------------
def falcon_attention_forward(hidden_states, w_qkv, w_dense, position_ids):
    B, S, Hs = hidden_states.shape
    H, D = N_HEAD, HEAD_DIM
    half = D // 2
    HD = H * D

    # Weight prep happens once at trace time, outside the kernel: split the
    # fused QKV weight (so no thin lane-slices of the QKV output are needed),
    # pre-transpose the dense weight (per-head slices become sublane slices),
    # and cast everything the MXU touches to bf16.
    w_q = w_qkv[:HD].astype(jnp.bfloat16)                 # (H*D, Hs)
    w_k = w_qkv[HD:HD + D].astype(jnp.bfloat16)           # (D, Hs)
    w_v = w_qkv[HD + D:HD + 2 * D].astype(jnp.bfloat16)   # (D, Hs)
    w_d_t = w_dense.T.astype(jnp.bfloat16)                # (H*D, Hs)

    # Half-width RoPE tables per flattened (b, s) row; the 1/sqrt(head_dim)
    # attention scale is folded into the q tables only.
    inv_freq = 1.0 / (10000.0 ** (jnp.arange(0, D, 2, dtype=jnp.float32) / D))
    pos = position_ids[0].astype(jnp.float32)             # (S,)
    freqs = pos[:, None] * inv_freq[None, :]              # (S, half)
    cos_h = jnp.cos(freqs)
    sin_h = jnp.sin(freqs)
    cos_b = jnp.tile(cos_h, (B, 1))                       # (B*S, half)
    sin_b = jnp.tile(sin_h, (B, 1))
    scale = 1.0 / math.sqrt(D)
    cos_q = cos_b * scale
    sin_q = sin_b * scale
    cos_k = cos_b
    sin_k = sin_b

    x2d = hidden_states.reshape(B * S, Hs).astype(jnp.bfloat16)   # lane-dense

    operands = (x2d, w_q, w_k, w_v, w_d_t, cos_q, sin_q, cos_k, sin_k)
    kernel = functools.partial(_fused_attn_kernel, B=B, S=S, H=H, D=D)

    out2d = pl.pallas_call(
        kernel,
        out_shape=jax.ShapeDtypeStruct((B * S, Hs), jnp.float32),
        grid=(1,),
        in_specs=[pl.BlockSpec(op.shape, lambda i: (0, 0)) for op in operands],
        out_specs=pl.BlockSpec((B * S, Hs), lambda i: (0, 0)),
        compiler_params=pltpu.CompilerParams(
            dimension_semantics=("arbitrary",)),
    )(*operands)

    return out2d.reshape(B, S, Hs)


# ---------------------------------------------------------------------------
# Pure-JAX reference (mirrors the PyTorch forward) for a sanity check
# ---------------------------------------------------------------------------
def _rotate_half(x):
    h = x.shape[-1] // 2
    return jnp.concatenate([-x[..., h:], x[..., :h]], axis=-1)


def reference_forward(hidden_states, w_qkv, w_dense, position_ids):
    B, S, Hs = hidden_states.shape
    fused = (hidden_states @ w_qkv.T).reshape(B, S, N_HEAD + 2, HEAD_DIM)
    q = jnp.transpose(fused[:, :, :-2, :], (0, 2, 1, 3))   # [B,H,S,D]
    k = fused[:, :, -2, :]                                  # [B,S,D]
    v = fused[:, :, -1, :]                                  # [B,S,D]
    inv_freq = 1.0 / (10000.0 ** (jnp.arange(0, HEAD_DIM, 2, dtype=jnp.float32)
                                  / HEAD_DIM))
    t = jnp.arange(S, dtype=jnp.float32)
    freqs = jnp.einsum("i,j->ij", t, inv_freq)
    emb = jnp.concatenate([freqs, freqs], axis=-1)
    cos = jnp.cos(emb)[position_ids[0]]
    sin = jnp.sin(emb)[position_ids[0]]
    q = q * cos + _rotate_half(q) * sin
    k = k * cos + _rotate_half(k) * sin
    scale = 1.0 / math.sqrt(HEAD_DIM)
    s = jnp.einsum("bhqd,bkd->bhqk", q, k) * scale
    mask = jnp.tril(jnp.ones((S, S), dtype=bool))
    s = jnp.where(mask, s, -jnp.inf)
    p = jax.nn.softmax(s, axis=-1)
    o = jnp.einsum("bhqk,bkd->bhqd", p, v)
    o = jnp.transpose(o, (0, 2, 1, 3)).reshape(B, S, Hs)
    return o @ w_dense.T


# ---------------------------------------------------------------------------
if __name__ == "__main__":
    key = jax.random.PRNGKey(0)
    k1, k2, k3 = jax.random.split(key, 3)

    hidden_states = jax.random.normal(k1, (BATCH, SEQ, HIDDEN), dtype=jnp.float32)
    # query_key_value weight: [hidden + 2*head_dim, hidden] (multi_query, bias=False)
    w_qkv = jax.random.normal(k2, (HIDDEN + 2 * HEAD_DIM, HIDDEN),
                              dtype=jnp.float32) * 0.05
    # dense weight: [hidden, hidden]
    w_dense = jax.random.normal(k3, (HIDDEN, HIDDEN), dtype=jnp.float32) * 0.05
    position_ids = jnp.arange(SEQ, dtype=jnp.int32)[None, :]

    out = falcon_attention_forward(hidden_states, w_qkv, w_dense, position_ids)
    out = jax.block_until_ready(out)

    ref = reference_forward(hidden_states, w_qkv, w_dense, position_ids)
    assert out.shape == (BATCH, SEQ, HIDDEN)
    # bf16 MXU operands + approx reciprocal vs f32 reference -> loose tolerance
    assert jnp.allclose(out, ref, atol=3e-2, rtol=3e-2), \
        float(jnp.max(jnp.abs(out - ref)))

    print("KERNEL_OK")
</pallas_src>

<mosaic_0001>
module attributes {stable_mosaic.version = 11 : i64} {
  func.func @_fused_attn_kernel(%arg0: i32, %arg1: memref<32x128xbf16, #tpu.memory_space<vmem>>, %arg2: memref<128x128xbf16, #tpu.memory_space<vmem>>, %arg3: memref<32x128xbf16, #tpu.memory_space<vmem>>, %arg4: memref<32x128xbf16, #tpu.memory_space<vmem>>, %arg5: memref<128x128xbf16, #tpu.memory_space<vmem>>, %arg6: memref<32x16xf32, #tpu.memory_space<vmem>>, %arg7: memref<32x16xf32, #tpu.memory_space<vmem>>, %arg8: memref<32x16xf32, #tpu.memory_space<vmem>>, %arg9: memref<32x16xf32, #tpu.memory_space<vmem>>, %arg10: memref<32x128xf32, #tpu.memory_space<vmem>>) attributes {dimension_semantics = [#tpu.dimension_semantics<arbitrary>], iteration_bounds = array<i64: 1>, scalar_prefetch = 0 : i64, scratch_operands = 0 : i64, tpu.core_type = #tpu.core_type<tc>, window_params = [{pipeline_mode = #tpu.pipeline_mode<synchronous>, transform_indices = @transform_0, window_bounds = array<i64: 32, 128>}, {pipeline_mode = #tpu.pipeline_mode<synchronous>, transform_indices = @transform_1, window_bounds = array<i64: 128, 128>}, {pipeline_mode = #tpu.pipeline_mode<synchronous>, transform_indices = @transform_2, window_bounds = array<i64: 32, 128>}, {pipeline_mode = #tpu.pipeline_mode<synchronous>, transform_indices = @transform_3, window_bounds = array<i64: 32, 128>}, {pipeline_mode = #tpu.pipeline_mode<synchronous>, transform_indices = @transform_4, window_bounds = array<i64: 128, 128>}, {pipeline_mode = #tpu.pipeline_mode<synchronous>, transform_indices = @transform_5, window_bounds = array<i64: 32, 16>}, {pipeline_mode = #tpu.pipeline_mode<synchronous>, transform_indices = @transform_6, window_bounds = array<i64: 32, 16>}, {pipeline_mode = #tpu.pipeline_mode<synchronous>, transform_indices = @transform_7, window_bounds = array<i64: 32, 16>}, {pipeline_mode = #tpu.pipeline_mode<synchronous>, transform_indices = @transform_8, window_bounds = array<i64: 32, 16>}, {pipeline_mode = #tpu.pipeline_mode<synchronous>, transform_indices = @transform_9, window_bounds = array<i64: 32, 128>}]} {
    %c0 = arith.constant 0 : index
    %c0_0 = arith.constant 0 : index
    %0 = vector.load %arg1[%c0, %c0_0] : memref<32x128xbf16, #tpu.memory_space<vmem>>, vector<32x128xbf16>
    %c0_1 = arith.constant 0 : index
    %c0_2 = arith.constant 0 : index
    %1 = vector.load %arg3[%c0_1, %c0_2] : memref<32x128xbf16, #tpu.memory_space<vmem>>, vector<16x128xbf16>
    %cst = arith.constant dense<0.000000e+00> : vector<32x16xf32>
    %2 = tpu.matmul %0, %1, %cst {dimension_numbers = #tpu.dot_dimension_numbers<[1], [1], [0], [0], [0, 0, 1, 0], [], []>} : vector<32x128xbf16>, vector<16x128xbf16>, vector<32x16xf32> -> vector<32x16xf32>
    %c16 = arith.constant 16 : index
    %c0_3 = arith.constant 0 : index
    %3 = vector.load %arg3[%c16, %c0_3] : memref<32x128xbf16, #tpu.memory_space<vmem>>, vector<16x128xbf16>
    %cst_4 = arith.constant dense<0.000000e+00> : vector<32x16xf32>
    %4 = tpu.matmul %0, %3, %cst_4 {dimension_numbers = #tpu.dot_dimension_numbers<[1], [1], [0], [0], [0, 0, 1, 0], [], []>} : vector<32x128xbf16>, vector<16x128xbf16>, vector<32x16xf32> -> vector<32x16xf32>
    %c0_5 = arith.constant 0 : index
    %c0_6 = arith.constant 0 : index
    %5 = vector.load %arg8[%c0_5, %c0_6] : memref<32x16xf32, #tpu.memory_space<vmem>>, vector<32x16xf32>
    %c0_7 = arith.constant 0 : index
    %c0_8 = arith.constant 0 : index
    %6 = vector.load %arg9[%c0_7, %c0_8] : memref<32x16xf32, #tpu.memory_space<vmem>>, vector<32x16xf32>
    %7 = arith.mulf %2, %5 : vector<32x16xf32>
    %8 = arith.mulf %4, %6 : vector<32x16xf32>
    %9 = arith.subf %7, %8 : vector<32x16xf32>
    %10 = arith.truncf %9 : vector<32x16xf32> to vector<32x16xbf16>
    %11 = arith.mulf %4, %5 : vector<32x16xf32>
    %12 = arith.mulf %2, %6 : vector<32x16xf32>
    %13 = arith.addf %11, %12 : vector<32x16xf32>
    %14 = arith.truncf %13 : vector<32x16xf32> to vector<32x16xbf16>
    %c0_9 = arith.constant 0 : index
    %c0_10 = arith.constant 0 : index
    %15 = vector.load %arg4[%c0_9, %c0_10] : memref<32x128xbf16, #tpu.memory_space<vmem>>, vector<32x128xbf16>
    %cst_11 = arith.constant dense<0.000000e+00> : vector<32x32xf32>
    %16 = tpu.matmul %0, %15, %cst_11 {dimension_numbers = #tpu.dot_dimension_numbers<[1], [1], [0], [0], [0, 0, 1, 0], [], []>} : vector<32x128xbf16>, vector<32x128xbf16>, vector<32x32xf32> -> vector<32x32xf32>
    %17 = arith.truncf %16 : vector<32x32xf32> to vector<32x32xbf16>
    %18 = tpu.iota {dimensions = array<i32: 0>} : vector<16x16xi32>
    %19 = tpu.iota {dimensions = array<i32: 1>} : vector<16x16xi32>
    %20 = arith.cmpi sge, %18, %19 : vector<16x16xi32>
    %cst_12 = arith.constant 0.000000e+00 : f32
    %cst_13 = arith.constant -1.000000e+30 : f32
    %21 = vector.broadcast %cst_12 : f32 to vector<16x16xf32>
    %22 = vector.broadcast %cst_13 : f32 to vector<16x16xf32>
    %23 = arith.select %20, %21, %22 : vector<16x16xi1>, vector<16x16xf32>
    %c0_14 = arith.constant 0 : index
    %c0_15 = arith.constant 0 : index
    %24 = vector.load %arg6[%c0_14, %c0_15] : memref<32x16xf32, #tpu.memory_space<vmem>>, vector<32x16xf32>
    %c0_16 = arith.constant 0 : index
    %c0_17 = arith.constant 0 : index
    %25 = vector.load %arg7[%c0_16, %c0_17] : memref<32x16xf32, #tpu.memory_space<vmem>>, vector<32x16xf32>
    %cst_18 = arith.constant 0.000000e+00 : f32
    %26 = vector.broadcast %cst_18 : f32 to vector<16x128xf32>
    %cst_19 = arith.constant 0.000000e+00 : f32
    %27 = vector.broadcast %cst_19 : f32 to vector<16x128xf32>
    %c0_20 = arith.constant 0 : index
    %c0_21 = arith.constant 0 : index
    %28 = vector.load %arg2[%c0_20, %c0_21] : memref<128x128xbf16, #tpu.memory_space<vmem>>, vector<16x128xbf16>
    %cst_22 = arith.constant dense<0.000000e+00> : vector<32x16xf32>
    %29 = tpu.matmul %0, %28, %cst_22 {dimension_numbers = #tpu.dot_dimension_numbers<[1], [1], [0], [0], [0, 0, 1, 0], [], []>} : vector<32x128xbf16>, vector<16x128xbf16>, vector<32x16xf32> -> vector<32x16xf32>
    %c16_23 = arith.constant 16 : index
    %c0_24 = arith.constant 0 : index
    %30 = vector.load %arg2[%c16_23, %c0_24] : memref<128x128xbf16, #tpu.memory_space<vmem>>, vector<16x128xbf16>
    %cst_25 = arith.constant dense<0.000000e+00> : vector<32x16xf32>
    %31 = tpu.matmul %0, %30, %cst_25 {dimension_numbers = #tpu.dot_dimension_numbers<[1], [1], [0], [0], [0, 0, 1, 0], [], []>} : vector<32x128xbf16>, vector<16x128xbf16>, vector<32x16xf32> -> vector<32x16xf32>
    %32 = arith.mulf %29, %24 : vector<32x16xf32>
    %33 = arith.mulf %31, %25 : vector<32x16xf32>
    %34 = arith.subf %32, %33 : vector<32x16xf32>
    %35 = arith.truncf %34 : vector<32x16xf32> to vector<32x16xbf16>
    %36 = arith.mulf %31, %24 : vector<32x16xf32>
    %37 = arith.mulf %29, %25 : vector<32x16xf32>
    %38 = arith.addf %36, %37 : vector<32x16xf32>
    %39 = arith.truncf %38 : vector<32x16xf32> to vector<32x16xbf16>
    %c0_26 = arith.constant 0 : index
    %c0_27 = arith.constant 0 : index
    %40 = vector.load %arg5[%c0_26, %c0_27] : memref<128x128xbf16, #tpu.memory_space<vmem>>, vector<32x128xbf16>
    %41 = vector.extract_strided_slice %35 {offsets = [0, 0], sizes = [16, 16], strides = [1, 1]} : vector<32x16xbf16> to vector<16x16xbf16>
    %42 = vector.extract_strided_slice %10 {offsets = [0, 0], sizes = [16, 16], strides = [1, 1]} : vector<32x16xbf16> to vector<16x16xbf16>
    %cst_28 = arith.constant dense<0.000000e+00> : vector<16x16xf32>
    %43 = tpu.matmul %41, %42, %cst_28 {dimension_numbers = #tpu.dot_dimension_numbers<[1], [1], [0], [0], [0, 0, 1, 0], [], []>} : vector<16x16xbf16>, vector<16x16xbf16>, vector<16x16xf32> -> vector<16x16xf32>
    %44 = vector.extract_strided_slice %39 {offsets = [0, 0], sizes = [16, 16], strides = [1, 1]} : vector<32x16xbf16> to vector<16x16xbf16>
    %45 = vector.extract_strided_slice %14 {offsets = [0, 0], sizes = [16, 16], strides = [1, 1]} : vector<32x16xbf16> to vector<16x16xbf16>
    %cst_29 = arith.constant dense<0.000000e+00> : vector<16x16xf32>
    %46 = tpu.matmul %44, %45, %cst_29 {dimension_numbers = #tpu.dot_dimension_numbers<[1], [1], [0], [0], [0, 0, 1, 0], [], []>} : vector<16x16xbf16>, vector<16x16xbf16>, vector<16x16xf32> -> vector<16x16xf32>
    %47 = arith.addf %43, %46 : vector<16x16xf32>
    %48 = arith.addf %47, %23 : vector<16x16xf32>
    %cst_30 = arith.constant dense<0xFF800000> : vector<16xf32>
    %49 = vector.multi_reduction <maximumf>, %48, %cst_30 [1] : vector<16x16xf32> to vector<16xf32>
    %50 = vector.shape_cast %49 : vector<16xf32> to vector<16x1xf32>
    %51 = vector.broadcast %50 : vector<16x1xf32> to vector<16x16xf32>
    %52 = arith.subf %48, %51 : vector<16x16xf32>
    %53 = math.exp %52 : vector<16x16xf32>
    %cst_31 = arith.constant dense<0.000000e+00> : vector<16xf32>
    %54 = vector.multi_reduction <add>, %53, %cst_31 [1] : vector<16x16xf32> to vector<16xf32>
    %55 = vector.shape_cast %54 : vector<16xf32> to vector<16x1xf32>
    %56 = tpu.reciprocal %55 {approx = true} : vector<16x1xf32> -> vector<16x1xf32>
    %57 = vector.broadcast %56 : vector<16x1xf32> to vector<16x16xf32>
    %58 = arith.mulf %53, %57 : vector<16x16xf32>
    %59 = arith.truncf %58 : vector<16x16xf32> to vector<16x16xbf16>
    %60 = vector.extract_strided_slice %17 {offsets = [0, 0], sizes = [16, 32], strides = [1, 1]} : vector<32x32xbf16> to vector<16x32xbf16>
    %cst_32 = arith.constant dense<0.000000e+00> : vector<16x32xf32>
    %61 = tpu.matmul %59, %60, %cst_32 {dimension_numbers = #tpu.dot_dimension_numbers<[1], [0], [0], [1], [0, 0, 1, 1], [], []>} : vector<16x16xbf16>, vector<16x32xbf16>, vector<16x32xf32> -> vector<16x32xf32>
    %62 = arith.truncf %61 : vector<16x32xf32> to vector<16x32xbf16>
    %cst_33 = arith.constant dense<0.000000e+00> : vector<16x128xf32>
    %63 = tpu.matmul %62, %40, %cst_33 {dimension_numbers = #tpu.dot_dimension_numbers<[1], [0], [0], [1], [0, 0, 1, 1], [], []>} : vector<16x32xbf16>, vector<32x128xbf16>, vector<16x128xf32> -> vector<16x128xf32>
    %64 = arith.addf %26, %63 : vector<16x128xf32>
    %65 = vector.extract_strided_slice %35 {offsets = [16, 0], sizes = [16, 16], strides = [1, 1]} : vector<32x16xbf16> to vector<16x16xbf16>
    %66 = vector.extract_strided_slice %10 {offsets = [16, 0], sizes = [16, 16], strides = [1, 1]} : vector<32x16xbf16> to vector<16x16xbf16>
    %cst_34 = arith.constant dense<0.000000e+00> : vector<16x16xf32>
    %67 = tpu.matmul %65, %66, %cst_34 {dimension_numbers = #tpu.dot_dimension_numbers<[1], [1], [0], [0], [0, 0, 1, 0], [], []>} : vector<16x16xbf16>, vector<16x16xbf16>, vector<16x16xf32> -> vector<16x16xf32>
    %68 = vector.extract_strided_slice %39 {offsets = [16, 0], sizes = [16, 16], strides = [1, 1]} : vector<32x16xbf16> to vector<16x16xbf16>
    %69 = vector.extract_strided_slice %14 {offsets = [16, 0], sizes = [16, 16], strides = [1, 1]} : vector<32x16xbf16> to vector<16x16xbf16>
    %cst_35 = arith.constant dense<0.000000e+00> : vector<16x16xf32>
    %70 = tpu.matmul %68, %69, %cst_35 {dimension_numbers = #tpu.dot_dimension_numbers<[1], [1], [0], [0], [0, 0, 1, 0], [], []>} : vector<16x16xbf16>, vector<16x16xbf16>, vector<16x16xf32> -> vector<16x16xf32>
    %71 = arith.addf %67, %70 : vector<16x16xf32>
    %72 = arith.addf %71, %23 : vector<16x16xf32>
    %cst_36 = arith.constant dense<0xFF800000> : vector<16xf32>
    %73 = vector.multi_reduction <maximumf>, %72, %cst_36 [1] : vector<16x16xf32> to vector<16xf32>
    %74 = vector.shape_cast %73 : vector<16xf32> to vector<16x1xf32>
    %75 = vector.broadcast %74 : vector<16x1xf32> to vector<16x16xf32>
    %76 = arith.subf %72, %75 : vector<16x16xf32>
    %77 = math.exp %76 : vector<16x16xf32>
    %cst_37 = arith.constant dense<0.000000e+00> : vector<16xf32>
    %78 = vector.multi_reduction <add>, %77, %cst_37 [1] : vector<16x16xf32> to vector<16xf32>
    %79 = vector.shape_cast %78 : vector<16xf32> to vector<16x1xf32>
    %80 = tpu.reciprocal %79 {approx = true} : vector<16x1xf32> -> vector<16x1xf32>
    %81 = vector.broadcast %80 : vector<16x1xf32> to vector<16x16xf32>
    %82 = arith.mulf %77, %81 : vector<16x16xf32>
    %83 = arith.truncf %82 : vector<16x16xf32> to vector<16x16xbf16>
    %84 = vector.extract_strided_slice %17 {offsets = [16, 0], sizes = [16, 32], strides = [1, 1]} : vector<32x32xbf16> to vector<16x32xbf16>
    %cst_38 = arith.constant dense<0.000000e+00> : vector<16x32xf32>
    %85 = tpu.matmul %83, %84, %cst_38 {dimension_numbers = #tpu.dot_dimension_numbers<[1], [0], [0], [1], [0, 0, 1, 1], [], []>} : vector<16x16xbf16>, vector<16x32xbf16>, vector<16x32xf32> -> vector<16x32xf32>
    %86 = arith.truncf %85 : vector<16x32xf32> to vector<16x32xbf16>
    %cst_39 = arith.constant dense<0.000000e+00> : vector<16x128xf32>
    %87 = tpu.matmul %86, %40, %cst_39 {dimension_numbers = #tpu.dot_dimension_numbers<[1], [0], [0], [1], [0, 0, 1, 1], [], []>} : vector<16x32xbf16>, vector<32x128xbf16>, vector<16x128xf32> -> vector<16x128xf32>
    %88 = arith.addf %27, %87 : vector<16x128xf32>
    %c32 = arith.constant 32 : index
    %c0_40 = arith.constant 0 : index
    %89 = vector.load %arg2[%c32, %c0_40] : memref<128x128xbf16, #tpu.memory_space<vmem>>, vector<16x128xbf16>
    %cst_41 = arith.constant dense<0.000000e+00> : vector<32x16xf32>
    %90 = tpu.matmul %0, %89, %cst_41 {dimension_numbers = #tpu.dot_dimension_numbers<[1], [1], [0], [0], [0, 0, 1, 0], [], []>} : vector<32x128xbf16>, vector<16x128xbf16>, vector<32x16xf32> -> vector<32x16xf32>
    %c48 = arith.constant 48 : index
    %c0_42 = arith.constant 0 : index
    %91 = vector.load %arg2[%c48, %c0_42] : memref<128x128xbf16, #tpu.memory_space<vmem>>, vector<16x128xbf16>
    %cst_43 = arith.constant dense<0.000000e+00> : vector<32x16xf32>
    %92 = tpu.matmul %0, %91, %cst_43 {dimension_numbers = #tpu.dot_dimension_numbers<[1], [1], [0], [0], [0, 0, 1, 0], [], []>} : vector<32x128xbf16>, vector<16x128xbf16>, vector<32x16xf32> -> vector<32x16xf32>
    %93 = arith.mulf %90, %24 : vector<32x16xf32>
    %94 = arith.mulf %92, %25 : vector<32x16xf32>
    %95 = arith.subf %93, %94 : vector<32x16xf32>
    %96 = arith.truncf %95 : vector<32x16xf32> to vector<32x16xbf16>
    %97 = arith.mulf %92, %24 : vector<32x16xf32>
    %98 = arith.mulf %90, %25 : vector<32x16xf32>
    %99 = arith.addf %97, %98 : vector<32x16xf32>
    %100 = arith.truncf %99 : vector<32x16xf32> to vector<32x16xbf16>
    %c32_44 = arith.constant 32 : index
    %c0_45 = arith.constant 0 : index
    %101 = vector.load %arg5[%c32_44, %c0_45] : memref<128x128xbf16, #tpu.memory_space<vmem>>, vector<32x128xbf16>
    %102 = vector.extract_strided_slice %96 {offsets = [0, 0], sizes = [16, 16], strides = [1, 1]} : vector<32x16xbf16> to vector<16x16xbf16>
    %103 = vector.extract_strided_slice %10 {offsets = [0, 0], sizes = [16, 16], strides = [1, 1]} : vector<32x16xbf16> to vector<16x16xbf16>
    %cst_46 = arith.constant dense<0.000000e+00> : vector<16x16xf32>
    %104 = tpu.matmul %102, %103, %cst_46 {dimension_numbers = #tpu.dot_dimension_numbers<[1], [1], [0], [0], [0, 0, 1, 0], [], []>} : vector<16x16xbf16>, vector<16x16xbf16>, vector<16x16xf32> -> vector<16x16xf32>
    %105 = vector.extract_strided_slice %100 {offsets = [0, 0], sizes = [16, 16], strides = [1, 1]} : vector<32x16xbf16> to vector<16x16xbf16>
    %106 = vector.extract_strided_slice %14 {offsets = [0, 0], sizes = [16, 16], strides = [1, 1]} : vector<32x16xbf16> to vector<16x16xbf16>
    %cst_47 = arith.constant dense<0.000000e+00> : vector<16x16xf32>
    %107 = tpu.matmul %105, %106, %cst_47 {dimension_numbers = #tpu.dot_dimension_numbers<[1], [1], [0], [0], [0, 0, 1, 0], [], []>} : vector<16x16xbf16>, vector<16x16xbf16>, vector<16x16xf32> -> vector<16x16xf32>
    %108 = arith.addf %104, %107 : vector<16x16xf32>
    %109 = arith.addf %108, %23 : vector<16x16xf32>
    %cst_48 = arith.constant dense<0xFF800000> : vector<16xf32>
    %110 = vector.multi_reduction <maximumf>, %109, %cst_48 [1] : vector<16x16xf32> to vector<16xf32>
    %111 = vector.shape_cast %110 : vector<16xf32> to vector<16x1xf32>
    %112 = vector.broadcast %111 : vector<16x1xf32> to vector<16x16xf32>
    %113 = arith.subf %109, %112 : vector<16x16xf32>
    %114 = math.exp %113 : vector<16x16xf32>
    %cst_49 = arith.constant dense<0.000000e+00> : vector<16xf32>
    %115 = vector.multi_reduction <add>, %114, %cst_49 [1] : vector<16x16xf32> to vector<16xf32>
    %116 = vector.shape_cast %115 : vector<16xf32> to vector<16x1xf32>
    %117 = tpu.reciprocal %116 {approx = true} : vector<16x1xf32> -> vector<16x1xf32>
    %118 = vector.broadcast %117 : vector<16x1xf32> to vector<16x16xf32>
    %119 = arith.mulf %114, %118 : vector<16x16xf32>
    %120 = arith.truncf %119 : vector<16x16xf32> to vector<16x16xbf16>
    %121 = vector.extract_strided_slice %17 {offsets = [0, 0], sizes = [16, 32], strides = [1, 1]} : vector<32x32xbf16> to vector<16x32xbf16>
    %cst_50 = arith.constant dense<0.000000e+00> : vector<16x32xf32>
    %122 = tpu.matmul %120, %121, %cst_50 {dimension_numbers = #tpu.dot_dimension_numbers<[1], [0], [0], [1], [0, 0, 1, 1], [], []>} : vector<16x16xbf16>, vector<16x32xbf16>, vector<16x32xf32> -> vector<16x32xf32>
    %123 = arith.truncf %122 : vector<16x32xf32> to vector<16x32xbf16>
    %cst_51 = arith.constant dense<0.000000e+00> : vector<16x128xf32>
    %124 = tpu.matmul %123, %101, %cst_51 {dimension_numbers = #tpu.dot_dimension_numbers<[1], [0], [0], [1], [0, 0, 1, 1], [], []>} : vector<16x32xbf16>, vector<32x128xbf16>, vector<16x128xf32> -> vector<16x128xf32>
    %125 = arith.addf %64, %124 : vector<16x128xf32>
    %126 = vector.extract_strided_slice %96 {offsets = [16, 0], sizes = [16, 16], strides = [1, 1]} : vector<32x16xbf16> to vector<16x16xbf16>
    %127 = vector.extract_strided_slice %10 {offsets = [16, 0], sizes = [16, 16], strides = [1, 1]} : vector<32x16xbf16> to vector<16x16xbf16>
    %cst_52 = arith.constant dense<0.000000e+00> : vector<16x16xf32>
    %128 = tpu.matmul %126, %127, %cst_52 {dimension_numbers = #tpu.dot_dimension_numbers<[1], [1], [0], [0], [0, 0, 1, 0], [], []>} : vector<16x16xbf16>, vector<16x16xbf16>, vector<16x16xf32> -> vector<16x16xf32>
    %129 = vector.extract_strided_slice %100 {offsets = [16, 0], sizes = [16, 16], strides = [1, 1]} : vector<32x16xbf16> to vector<16x16xbf16>
    %130 = vector.extract_strided_slice %14 {offsets = [16, 0], sizes = [16, 16], strides = [1, 1]} : vector<32x16xbf16> to vector<16x16xbf16>
    %cst_53 = arith.constant dense<0.000000e+00> : vector<16x16xf32>
    %131 = tpu.matmul %129, %130, %cst_53 {dimension_numbers = #tpu.dot_dimension_numbers<[1], [1], [0], [0], [0, 0, 1, 0], [], []>} : vector<16x16xbf16>, vector<16x16xbf16>, vector<16x16xf32> -> vector<16x16xf32>
    %132 = arith.addf %128, %131 : vector<16x16xf32>
    %133 = arith.addf %132, %23 : vector<16x16xf32>
    %cst_54 = arith.constant dense<0xFF800000> : vector<16xf32>
    %134 = vector.multi_reduction <maximumf>, %133, %cst_54 [1] : vector<16x16xf32> to vector<16xf32>
    %135 = vector.shape_cast %134 : vector<16xf32> to vector<16x1xf32>
    %136 = vector.broadcast %135 : vector<16x1xf32> to vector<16x16xf32>
    %137 = arith.subf %133, %136 : vector<16x16xf32>
    %138 = math.exp %137 : vector<16x16xf32>
    %cst_55 = arith.constant dense<0.000000e+00> : vector<16xf32>
    %139 = vector.multi_reduction <add>, %138, %cst_55 [1] : vector<16x16xf32> to vector<16xf32>
    %140 = vector.shape_cast %139 : vector<16xf32> to vector<16x1xf32>
    %141 = tpu.reciprocal %140 {approx = true} : vector<16x1xf32> -> vector<16x1xf32>
    %142 = vector.broadcast %141 : vector<16x1xf32> to vector<16x16xf32>
    %143 = arith.mulf %138, %142 : vector<16x16xf32>
    %144 = arith.truncf %143 : vector<16x16xf32> to vector<16x16xbf16>
    %145 = vector.extract_strided_slice %17 {offsets = [16, 0], sizes = [16, 32], strides = [1, 1]} : vector<32x32xbf16> to vector<16x32xbf16>
    %cst_56 = arith.constant dense<0.000000e+00> : vector<16x32xf32>
    %146 = tpu.matmul %144, %145, %cst_56 {dimension_numbers = #tpu.dot_dimension_numbers<[1], [0], [0], [1], [0, 0, 1, 1], [], []>} : vector<16x16xbf16>, vector<16x32xbf16>, vector<16x32xf32> -> vector<16x32xf32>
    %147 = arith.truncf %146 : vector<16x32xf32> to vector<16x32xbf16>
    %cst_57 = arith.constant dense<0.000000e+00> : vector<16x128xf32>
    %148 = tpu.matmul %147, %101, %cst_57 {dimension_numbers = #tpu.dot_dimension_numbers<[1], [0], [0], [1], [0, 0, 1, 1], [], []>} : vector<16x32xbf16>, vector<32x128xbf16>, vector<16x128xf32> -> vector<16x128xf32>
    %149 = arith.addf %88, %148 : vector<16x128xf32>
    %c64 = arith.constant 64 : index
    %c0_58 = arith.constant 0 : index
    %150 = vector.load %arg2[%c64, %c0_58] : memref<128x128xbf16, #tpu.memory_space<vmem>>, vector<16x128xbf16>
    %cst_59 = arith.constant dense<0.000000e+00> : vector<32x16xf32>
    %151 = tpu.matmul %0, %150, %cst_59 {dimension_numbers = #tpu.dot_dimension_numbers<[1], [1], [0], [0], [0, 0, 1, 0], [], []>} : vector<32x128xbf16>, vector<16x128xbf16>, vector<32x16xf32> -> vector<32x16xf32>
    %c80 = arith.constant 80 : index
    %c0_60 = arith.constant 0 : index
    %152 = vector.load %arg2[%c80, %c0_60] : memref<128x128xbf16, #tpu.memory_space<vmem>>, vector<16x128xbf16>
    %cst_61 = arith.constant dense<0.000000e+00> : vector<32x16xf32>
    %153 = tpu.matmul %0, %152, %cst_61 {dimension_numbers = #tpu.dot_dimension_numbers<[1], [1], [0], [0], [0, 0, 1, 0], [], []>} : vector<32x128xbf16>, vector<16x128xbf16>, vector<32x16xf32> -> vector<32x16xf32>
    %154 = arith.mulf %151, %24 : vector<32x16xf32>
    %155 = arith.mulf %153, %25 : vector<32x16xf32>
    %156 = arith.subf %154, %155 : vector<32x16xf32>
    %157 = arith.truncf %156 : vector<32x16xf32> to vector<32x16xbf16>
    %158 = arith.mulf %153, %24 : vector<32x16xf32>
    %159 = arith.mulf %151, %25 : vector<32x16xf32>
    %160 = arith.addf %158, %159 : vector<32x16xf32>
    %161 = arith.truncf %160 : vector<32x16xf32> to vector<32x16xbf16>
    %c64_62 = arith.constant 64 : index
    %c0_63 = arith.constant 0 : index
    %162 = vector.load %arg5[%c64_62, %c0_63] : memref<128x128xbf16, #tpu.memory_space<vmem>>, vector<32x128xbf16>
    %163 = vector.extract_strided_slice %157 {offsets = [0, 0], sizes = [16, 16], strides = [1, 1]} : vector<32x16xbf16> to vector<16x16xbf16>
    %164 = vector.extract_strided_slice %10 {offsets = [0, 0], sizes = [16, 16], strides = [1, 1]} : vector<32x16xbf16> to vector<16x16xbf16>
    %cst_64 = arith.constant dense<0.000000e+00> : vector<16x16xf32>
    %165 = tpu.matmul %163, %164, %cst_64 {dimension_numbers = #tpu.dot_dimension_numbers<[1], [1], [0], [0], [0, 0, 1, 0], [], []>} : vector<16x16xbf16>, vector<16x16xbf16>, vector<16x16xf32> -> vector<16x16xf32>
    %166 = vector.extract_strided_slice %161 {offsets = [0, 0], sizes = [16, 16], strides = [1, 1]} : vector<32x16xbf16> to vector<16x16xbf16>
    %167 = vector.extract_strided_slice %14 {offsets = [0, 0], sizes = [16, 16], strides = [1, 1]} : vector<32x16xbf16> to vector<16x16xbf16>
    %cst_65 = arith.constant dense<0.000000e+00> : vector<16x16xf32>
    %168 = tpu.matmul %166, %167, %cst_65 {dimension_numbers = #tpu.dot_dimension_numbers<[1], [1], [0], [0], [0, 0, 1, 0], [], []>} : vector<16x16xbf16>, vector<16x16xbf16>, vector<16x16xf32> -> vector<16x16xf32>
    %169 = arith.addf %165, %168 : vector<16x16xf32>
    %170 = arith.addf %169, %23 : vector<16x16xf32>
    %cst_66 = arith.constant dense<0xFF800000> : vector<16xf32>
    %171 = vector.multi_reduction <maximumf>, %170, %cst_66 [1] : vector<16x16xf32> to vector<16xf32>
    %172 = vector.shape_cast %171 : vector<16xf32> to vector<16x1xf32>
    %173 = vector.broadcast %172 : vector<16x1xf32> to vector<16x16xf32>
    %174 = arith.subf %170, %173 : vector<16x16xf32>
    %175 = math.exp %174 : vector<16x16xf32>
    %cst_67 = arith.constant dense<0.000000e+00> : vector<16xf32>
    %176 = vector.multi_reduction <add>, %175, %cst_67 [1] : vector<16x16xf32> to vector<16xf32>
    %177 = vector.shape_cast %176 : vector<16xf32> to vector<16x1xf32>
    %178 = tpu.reciprocal %177 {approx = true} : vector<16x1xf32> -> vector<16x1xf32>
    %179 = vector.broadcast %178 : vector<16x1xf32> to vector<16x16xf32>
    %180 = arith.mulf %175, %179 : vector<16x16xf32>
    %181 = arith.truncf %180 : vector<16x16xf32> to vector<16x16xbf16>
    %182 = vector.extract_strided_slice %17 {offsets = [0, 0], sizes = [16, 32], strides = [1, 1]} : vector<32x32xbf16> to vector<16x32xbf16>
    %cst_68 = arith.constant dense<0.000000e+00> : vector<16x32xf32>
    %183 = tpu.matmul %181, %182, %cst_68 {dimension_numbers = #tpu.dot_dimension_numbers<[1], [0], [0], [1], [0, 0, 1, 1], [], []>} : vector<16x16xbf16>, vector<16x32xbf16>, vector<16x32xf32> -> vector<16x32xf32>
    %184 = arith.truncf %183 : vector<16x32xf32> to vector<16x32xbf16>
    %cst_69 = arith.constant dense<0.000000e+00> : vector<16x128xf32>
    %185 = tpu.matmul %184, %162, %cst_69 {dimension_numbers = #tpu.dot_dimension_numbers<[1], [0], [0], [1], [0, 0, 1, 1], [], []>} : vector<16x32xbf16>, vector<32x128xbf16>, vector<16x128xf32> -> vector<16x128xf32>
    %186 = arith.addf %125, %185 : vector<16x128xf32>
    %187 = vector.extract_strided_slice %157 {offsets = [16, 0], sizes = [16, 16], strides = [1, 1]} : vector<32x16xbf16> to vector<16x16xbf16>
    %188 = vector.extract_strided_slice %10 {offsets = [16, 0], sizes = [16, 16], strides = [1, 1]} : vector<32x16xbf16> to vector<16x16xbf16>
    %cst_70 = arith.constant dense<0.000000e+00> : vector<16x16xf32>
    %189 = tpu.matmul %187, %188, %cst_70 {dimension_numbers = #tpu.dot_dimension_numbers<[1], [1], [0], [0], [0, 0, 1, 0], [], []>} : vector<16x16xbf16>, vector<16x16xbf16>, vector<16x16xf32> -> vector<16x16xf32>
    %190 = vector.extract_strided_slice %161 {offsets = [16, 0], sizes = [16, 16], strides = [1, 1]} : vector<32x16xbf16> to vector<16x16xbf16>
    %191 = vector.extract_strided_slice %14 {offsets = [16, 0], sizes = [16, 16], strides = [1, 1]} : vector<32x16xbf16> to vector<16x16xbf16>
    %cst_71 = arith.constant dense<0.000000e+00> : vector<16x16xf32>
    %192 = tpu.matmul %190, %191, %cst_71 {dimension_numbers = #tpu.dot_dimension_numbers<[1], [1], [0], [0], [0, 0, 1, 0], [], []>} : vector<16x16xbf16>, vector<16x16xbf16>, vector<16x16xf32> -> vector<16x16xf32>
    %193 = arith.addf %189, %192 : vector<16x16xf32>
    %194 = arith.addf %193, %23 : vector<16x16xf32>
    %cst_72 = arith.constant dense<0xFF800000> : vector<16xf32>
    %195 = vector.multi_reduction <maximumf>, %194, %cst_72 [1] : vector<16x16xf32> to vector<16xf32>
    %196 = vector.shape_cast %195 : vector<16xf32> to vector<16x1xf32>
    %197 = vector.broadcast %196 : vector<16x1xf32> to vector<16x16xf32>
    %198 = arith.subf %194, %197 : vector<16x16xf32>
    %199 = math.exp %198 : vector<16x16xf32>
    %cst_73 = arith.constant dense<0.000000e+00> : vector<16xf32>
    %200 = vector.multi_reduction <add>, %199, %cst_73 [1] : vector<16x16xf32> to vector<16xf32>
    %201 = vector.shape_cast %200 : vector<16xf32> to vector<16x1xf32>
    %202 = tpu.reciprocal %201 {approx = true} : vector<16x1xf32> -> vector<16x1xf32>
    %203 = vector.broadcast %202 : vector<16x1xf32> to vector<16x16xf32>
    %204 = arith.mulf %199, %203 : vector<16x16xf32>
    %205 = arith.truncf %204 : vector<16x16xf32> to vector<16x16xbf16>
    %206 = vector.extract_strided_slice %17 {offsets = [16, 0], sizes = [16, 32], strides = [1, 1]} : vector<32x32xbf16> to vector<16x32xbf16>
    %cst_74 = arith.constant dense<0.000000e+00> : vector<16x32xf32>
    %207 = tpu.matmul %205, %206, %cst_74 {dimension_numbers = #tpu.dot_dimension_numbers<[1], [0], [0], [1], [0, 0, 1, 1], [], []>} : vector<16x16xbf16>, vector<16x32xbf16>, vector<16x32xf32> -> vector<16x32xf32>
    %208 = arith.truncf %207 : vector<16x32xf32> to vector<16x32xbf16>
    %cst_75 = arith.constant dense<0.000000e+00> : vector<16x128xf32>
    %209 = tpu.matmul %208, %162, %cst_75 {dimension_numbers = #tpu.dot_dimension_numbers<[1], [0], [0], [1], [0, 0, 1, 1], [], []>} : vector<16x32xbf16>, vector<32x128xbf16>, vector<16x128xf32> -> vector<16x128xf32>
    %210 = arith.addf %149, %209 : vector<16x128xf32>
    %c96 = arith.constant 96 : index
    %c0_76 = arith.constant 0 : index
    %211 = vector.load %arg2[%c96, %c0_76] : memref<128x128xbf16, #tpu.memory_space<vmem>>, vector<16x128xbf16>
    %cst_77 = arith.constant dense<0.000000e+00> : vector<32x16xf32>
    %212 = tpu.matmul %0, %211, %cst_77 {dimension_numbers = #tpu.dot_dimension_numbers<[1], [1], [0], [0], [0, 0, 1, 0], [], []>} : vector<32x128xbf16>, vector<16x128xbf16>, vector<32x16xf32> -> vector<32x16xf32>
    %c112 = arith.constant 112 : index
    %c0_78 = arith.constant 0 : index
    %213 = vector.load %arg2[%c112, %c0_78] : memref<128x128xbf16, #tpu.memory_space<vmem>>, vector<16x128xbf16>
    %cst_79 = arith.constant dense<0.000000e+00> : vector<32x16xf32>
    %214 = tpu.matmul %0, %213, %cst_79 {dimension_numbers = #tpu.dot_dimension_numbers<[1], [1], [0], [0], [0, 0, 1, 0], [], []>} : vector<32x128xbf16>, vector<16x128xbf16>, vector<32x16xf32> -> vector<32x16xf32>
    %215 = arith.mulf %212, %24 : vector<32x16xf32>
    %216 = arith.mulf %214, %25 : vector<32x16xf32>
    %217 = arith.subf %215, %216 : vector<32x16xf32>
    %218 = arith.truncf %217 : vector<32x16xf32> to vector<32x16xbf16>
    %219 = arith.mulf %214, %24 : vector<32x16xf32>
    %220 = arith.mulf %212, %25 : vector<32x16xf32>
    %221 = arith.addf %219, %220 : vector<32x16xf32>
    %222 = arith.truncf %221 : vector<32x16xf32> to vector<32x16xbf16>
    %c96_80 = arith.constant 96 : index
    %c0_81 = arith.constant 0 : index
    %223 = vector.load %arg5[%c96_80, %c0_81] : memref<128x128xbf16, #tpu.memory_space<vmem>>, vector<32x128xbf16>
    %224 = vector.extract_strided_slice %218 {offsets = [0, 0], sizes = [16, 16], strides = [1, 1]} : vector<32x16xbf16> to vector<16x16xbf16>
    %225 = vector.extract_strided_slice %10 {offsets = [0, 0], sizes = [16, 16], strides = [1, 1]} : vector<32x16xbf16> to vector<16x16xbf16>
    %cst_82 = arith.constant dense<0.000000e+00> : vector<16x16xf32>
    %226 = tpu.matmul %224, %225, %cst_82 {dimension_numbers = #tpu.dot_dimension_numbers<[1], [1], [0], [0], [0, 0, 1, 0], [], []>} : vector<16x16xbf16>, vector<16x16xbf16>, vector<16x16xf32> -> vector<16x16xf32>
    %227 = vector.extract_strided_slice %222 {offsets = [0, 0], sizes = [16, 16], strides = [1, 1]} : vector<32x16xbf16> to vector<16x16xbf16>
    %228 = vector.extract_strided_slice %14 {offsets = [0, 0], sizes = [16, 16], strides = [1, 1]} : vector<32x16xbf16> to vector<16x16xbf16>
    %cst_83 = arith.constant dense<0.000000e+00> : vector<16x16xf32>
    %229 = tpu.matmul %227, %228, %cst_83 {dimension_numbers = #tpu.dot_dimension_numbers<[1], [1], [0], [0], [0, 0, 1, 0], [], []>} : vector<16x16xbf16>, vector<16x16xbf16>, vector<16x16xf32> -> vector<16x16xf32>
    %230 = arith.addf %226, %229 : vector<16x16xf32>
    %231 = arith.addf %230, %23 : vector<16x16xf32>
    %cst_84 = arith.constant dense<0xFF800000> : vector<16xf32>
    %232 = vector.multi_reduction <maximumf>, %231, %cst_84 [1] : vector<16x16xf32> to vector<16xf32>
    %233 = vector.shape_cast %232 : vector<16xf32> to vector<16x1xf32>
    %234 = vector.broadcast %233 : vector<16x1xf32> to vector<16x16xf32>
    %235 = arith.subf %231, %234 : vector<16x16xf32>
    %236 = math.exp %235 : vector<16x16xf32>
    %cst_85 = arith.constant dense<0.000000e+00> : vector<16xf32>
    %237 = vector.multi_reduction <add>, %236, %cst_85 [1] : vector<16x16xf32> to vector<16xf32>
    %238 = vector.shape_cast %237 : vector<16xf32> to vector<16x1xf32>
    %239 = tpu.reciprocal %238 {approx = true} : vector<16x1xf32> -> vector<16x1xf32>
    %240 = vector.broadcast %239 : vector<16x1xf32> to vector<16x16xf32>
    %241 = arith.mulf %236, %240 : vector<16x16xf32>
    %242 = arith.truncf %241 : vector<16x16xf32> to vector<16x16xbf16>
    %243 = vector.extract_strided_slice %17 {offsets = [0, 0], sizes = [16, 32], strides = [1, 1]} : vector<32x32xbf16> to vector<16x32xbf16>
    %cst_86 = arith.constant dense<0.000000e+00> : vector<16x32xf32>
    %244 = tpu.matmul %242, %243, %cst_86 {dimension_numbers = #tpu.dot_dimension_numbers<[1], [0], [0], [1], [0, 0, 1, 1], [], []>} : vector<16x16xbf16>, vector<16x32xbf16>, vector<16x32xf32> -> vector<16x32xf32>
    %245 = arith.truncf %244 : vector<16x32xf32> to vector<16x32xbf16>
    %cst_87 = arith.constant dense<0.000000e+00> : vector<16x128xf32>
    %246 = tpu.matmul %245, %223, %cst_87 {dimension_numbers = #tpu.dot_dimension_numbers<[1], [0], [0], [1], [0, 0, 1, 1], [], []>} : vector<16x32xbf16>, vector<32x128xbf16>, vector<16x128xf32> -> vector<16x128xf32>
    %247 = arith.addf %186, %246 : vector<16x128xf32>
    %248 = vector.extract_strided_slice %218 {offsets = [16, 0], sizes = [16, 16], strides = [1, 1]} : vector<32x16xbf16> to vector<16x16xbf16>
    %249 = vector.extract_strided_slice %10 {offsets = [16, 0], sizes = [16, 16], strides = [1, 1]} : vector<32x16xbf16> to vector<16x16xbf16>
    %cst_88 = arith.constant dense<0.000000e+00> : vector<16x16xf32>
    %250 = tpu.matmul %248, %249, %cst_88 {dimension_numbers = #tpu.dot_dimension_numbers<[1], [1], [0], [0], [0, 0, 1, 0], [], []>} : vector<16x16xbf16>, vector<16x16xbf16>, vector<16x16xf32> -> vector<16x16xf32>
    %251 = vector.extract_strided_slice %222 {offsets = [16, 0], sizes = [16, 16], strides = [1, 1]} : vector<32x16xbf16> to vector<16x16xbf16>
    %252 = vector.extract_strided_slice %14 {offsets = [16, 0], sizes = [16, 16], strides = [1, 1]} : vector<32x16xbf16> to vector<16x16xbf16>
    %cst_89 = arith.constant dense<0.000000e+00> : vector<16x16xf32>
    %253 = tpu.matmul %251, %252, %cst_89 {dimension_numbers = #tpu.dot_dimension_numbers<[1], [1], [0], [0], [0, 0, 1, 0], [], []>} : vector<16x16xbf16>, vector<16x16xbf16>, vector<16x16xf32> -> vector<16x16xf32>
    %254 = arith.addf %250, %253 : vector<16x16xf32>
    %255 = arith.addf %254, %23 : vector<16x16xf32>
    %cst_90 = arith.constant dense<0xFF800000> : vector<16xf32>
    %256 = vector.multi_reduction <maximumf>, %255, %cst_90 [1] : vector<16x16xf32> to vector<16xf32>
    %257 = vector.shape_cast %256 : vector<16xf32> to vector<16x1xf32>
    %258 = vector.broadcast %257 : vector<16x1xf32> to vector<16x16xf32>
    %259 = arith.subf %255, %258 : vector<16x16xf32>
    %260 = math.exp %259 : vector<16x16xf32>
    %cst_91 = arith.constant dense<0.000000e+00> : vector<16xf32>
    %261 = vector.multi_reduction <add>, %260, %cst_91 [1] : vector<16x16xf32> to vector<16xf32>
    %262 = vector.shape_cast %261 : vector<16xf32> to vector<16x1xf32>
    %263 = tpu.reciprocal %262 {approx = true} : vector<16x1xf32> -> vector<16x1xf32>
    %264 = vector.broadcast %263 : vector<16x1xf32> to vector<16x16xf32>
    %265 = arith.mulf %260, %264 : vector<16x16xf32>
    %266 = arith.truncf %265 : vector<16x16xf32> to vector<16x16xbf16>
    %267 = vector.extract_strided_slice %17 {offsets = [16, 0], sizes = [16, 32], strides = [1, 1]} : vector<32x32xbf16> to vector<16x32xbf16>
    %cst_92 = arith.constant dense<0.000000e+00> : vector<16x32xf32>
    %268 = tpu.matmul %266, %267, %cst_92 {dimension_numbers = #tpu.dot_dimension_numbers<[1], [0], [0], [1], [0, 0, 1, 1], [], []>} : vector<16x16xbf16>, vector<16x32xbf16>, vector<16x32xf32> -> vector<16x32xf32>
    %269 = arith.truncf %268 : vector<16x32xf32> to vector<16x32xbf16>
    %cst_93 = arith.constant dense<0.000000e+00> : vector<16x128xf32>
    %270 = tpu.matmul %269, %223, %cst_93 {dimension_numbers = #tpu.dot_dimension_numbers<[1], [0], [0], [1], [0, 0, 1, 1], [], []>} : vector<16x32xbf16>, vector<32x128xbf16>, vector<16x128xf32> -> vector<16x128xf32>
    %271 = arith.addf %210, %270 : vector<16x128xf32>
    %c0_94 = arith.constant 0 : index
    %c0_95 = arith.constant 0 : index
    %272 = vector.load %arg10[%c0_94, %c0_95] : memref<32x128xf32, #tpu.memory_space<vmem>>, vector<16x128xf32>
    tpu.vector_store %arg10[%c0_94, %c0_95], %247 {strides = array<i32>} : memref<32x128xf32, #tpu.memory_space<vmem>>, vector<16x128xf32>,
    %c16_96 = arith.constant 16 : index
    %c0_97 = arith.constant 0 : index
    %273 = vector.load %arg10[%c16_96, %c0_97] : memref<32x128xf32, #tpu.memory_space<vmem>>, vector<16x128xf32>
    tpu.vector_store %arg10[%c16_96, %c0_97], %271 {strides = array<i32>} : memref<32x128xf32, #tpu.memory_space<vmem>>, vector<16x128xf32>,
    return
  }
  func.func @transform_0(%arg0: i32) -> (i32, i32) {
    %c0_i32 = arith.constant 0 : i32
    %c0_i32_0 = arith.constant 0 : i32
    %c0_i32_1 = arith.constant 0 : i32
    return %c0_i32, %c0_i32_0 : i32, i32
  }
  func.func @transform_1(%arg0: i32) -> (i32, i32) {
    %c0_i32 = arith.constant 0 : i32
    %c0_i32_0 = arith.constant 0 : i32
    %c0_i32_1 = arith.constant 0 : i32
    return %c0_i32, %c0_i32_0 : i32, i32
  }
  func.func @transform_2(%arg0: i32) -> (i32, i32) {
    %c0_i32 = arith.constant 0 : i32
    %c0_i32_0 = arith.constant 0 : i32
    %c0_i32_1 = arith.constant 0 : i32
    return %c0_i32, %c0_i32_0 : i32, i32
  }
  func.func @transform_3(%arg0: i32) -> (i32, i32) {
    %c0_i32 = arith.constant 0 : i32
    %c0_i32_0 = arith.constant 0 : i32
    %c0_i32_1 = arith.constant 0 : i32
    return %c0_i32, %c0_i32_0 : i32, i32
  }
  func.func @transform_4(%arg0: i32) -> (i32, i32) {
    %c0_i32 = arith.constant 0 : i32
    %c0_i32_0 = arith.constant 0 : i32
    %c0_i32_1 = arith.constant 0 : i32
    return %c0_i32, %c0_i32_0 : i32, i32
  }
  func.func @transform_5(%arg0: i32) -> (i32, i32) {
    %c0_i32 = arith.constant 0 : i32
    %c0_i32_0 = arith.constant 0 : i32
    %c0_i32_1 = arith.constant 0 : i32
    return %c0_i32, %c0_i32_0 : i32, i32
  }
  func.func @transform_6(%arg0: i32) -> (i32, i32) {
    %c0_i32 = arith.constant 0 : i32
    %c0_i32_0 = arith.constant 0 : i32
    %c0_i32_1 = arith.constant 0 : i32
    return %c0_i32, %c0_i32_0 : i32, i32
  }
  func.func @transform_7(%arg0: i32) -> (i32, i32) {
    %c0_i32 = arith.constant 0 : i32
    %c0_i32_0 = arith.constant 0 : i32
    %c0_i32_1 = arith.constant 0 : i32
    return %c0_i32, %c0_i32_0 : i32, i32
  }
  func.func @transform_8(%arg0: i32) -> (i32, i32) {
    %c0_i32 = arith.constant 0 : i32
    %c0_i32_0 = arith.constant 0 : i32
    %c0_i32_1 = arith.constant 0 : i32
    return %c0_i32, %c0_i32_0 : i32, i32
  }
  func.func @transform_9(%arg0: i32) -> (i32, i32) {
    %c0_i32 = arith.constant 0 : i32
    %c0_i32_0 = arith.constant 0 : i32
    %c0_i32_1 = arith.constant 0 : i32
    return %c0_i32, %c0_i32_0 : i32, i32
  }
}

</mosaic_0001>

<bundles_post_ra>
// kernel: tpu_custom_call.1
= control target key start
LH: loop header
LB: loop body
LE: loop exit
PB: predicated region body
PF: predicated region fallthrough
CT: control target
= control target key end

     0   :  { %14 = vsyncpa [#allocation3], 0  ;;  %s3829_s0 = inlined_call_operand.vmem [shape: bf16[32,128], index: 0, kind: input, shape index: {}]   ;;  %s3830_s1 = inlined_call_operand.vmem [shape: bf16[128,128], index: 1, kind: input, shape index: {}]   ;;  %s3831_s2 = inlined_call_operand.hbm [shape: bf16[32,128], index: 2, kind: input, shape index: {}]   ;;  %s3832_s3 = inlined_call_operand.hbm [shape: bf16[32,128], index: 3, kind: input, shape index: {}]   ;;  %s3833_s4 = inlined_call_operand.vmem [shape: bf16[128,128], index: 4, kind: input, shape index: {}]   ;;  %s3834_s5 = inlined_call_operand.vmem [shape: f32[32,16], index: 5, kind: input, shape index: {}]   ;;  %s3835_s6 = inlined_call_operand.vmem [shape: f32[32,16], index: 6, kind: input, shape index: {}]   ;;  %s3836_s7 = inlined_call_operand.vmem [shape: f32[32,16], index: 7, kind: input, shape index: {}]   ;;  %s3837_s8 = inlined_call_operand.vmem [shape: f32[32,16], index: 8, kind: input, shape index: {}]   ;;  %s3838_s9 = inlined_call_operand.hbm [shape: f32[32,128], index: 9, kind: output, shape index: {}]  }
   0x1   :  { %15 = vsyncpa [#allocation6], 0 }
   0x2   :  { %16 = vsyncpa [#allocation4], 0  ;;  %s3212_s30 = smov [#allocation2]  }
   0x3   :  { %s26_s10 = sshll.u32 %s3212_s30, 4  ;;  %s27_s10 = int_to_ptr.vmem [resolvable:$true] %s26_s10 }
   0x4   :  { %s3154_s11 = scalar_lea.vmem %s27_s10, 256  ;;  %p3159_p1 = scmp.lt.s32.totalorder %s27_s10, %s27_s10 }
   0x5   :  { %p3155_p0 = scmp.ne.s32.totalorder %s27_s10, %s3154_s11  ;;  %p3160_p2 = scmp.lt.s32.totalorder %s3154_s11, %s3154_s11 }
   0x7   :  { %p3161_p3 = por %p3160_p2, %p3159_p1 }
   0x9   :  { %p3162_p4 = pnand %p3161_p3, %p3155_p0 }
   0xb   :  { %3165 = shalt.err (!%p3162_p4)
}
   0xc   :  { %s3213_s12 = smov 64   ;;  %s3214_s13 = smov 4  }
   0xd   :  { %32 = dma.hbm_to_vmem [thread:$0]  %s3831_s2, 256, %s27_s10, [#allocation3], %s3213_s12, %s3213_s12, %s3214_s13  }
   0xe   :  { %s3215_s16 = smov [#allocation5]  }
   0xf   :  { %s38_s17 = sshll.u32 %s3215_s16, 4  ;;  %s39_s17 = int_to_ptr.vmem [resolvable:$true] %s38_s17 }
  0x10   :  { %s3174_s18 = scalar_lea.vmem %s39_s17, 256  ;;  %p3179_p6 = scmp.lt.s32.totalorder %s39_s17, %s39_s17 }
  0x11   :  { %p3175_p5 = scmp.ne.s32.totalorder %s39_s17, %s3174_s18  ;;  %p3180_p7 = scmp.lt.s32.totalorder %s3174_s18, %s3174_s18 }
  0x13   :  { %p3181_p8 = por %p3180_p7, %p3179_p6 }
  0x15   :  { %p3182_p9 = pnand %p3181_p8, %p3175_p5 }
  0x17   :  { %3185 = shalt.err (!%p3182_p9)
}
  0x18   :  { %44 = dma.hbm_to_vmem [thread:$0]  %s3832_s3, 256, %s39_s17, [#allocation6], %s3213_s12, %s3213_s12, %s3214_s13  }
  0x19   :  { %3206 = dma.done.wait [#allocation3], 256  }
  0x1a   :  { %3207 = vsyncadd [#allocation3], 4294967040 }
  0x1b   :  { %3208 = dma.done.wait [#allocation6], 256  }
  0x1c   :  { %3209 = vsyncadd [#allocation6], 4294967040  ;;  %v3050_v0 = vld [vmem:[#allocation2] sm:$0xff]   ;;  %v3051_v1 = vld [vmem:[#allocation2 + $0x8] sm:$0xff]   ;;  %v3216_v8 = vmov 0.0   ;;  %vm3217_vm0 = vmmov 0  }
  0x1d   :  { %2764 = vmatprep.subr.bf16.mxu0 %v3050_v0  ;;  %v3281_v2 = vld [vmem:[%s3829_s0] sm:$0xff]   ;;  %2770 = vmatprep.subr.bf16.mxu1 %v3051_v1  ;;  %v3291_v4 = vld [vmem:[%s3829_s0 + $0x8] sm:$0xff]   ;;  %v3056_v5 = vld [vmem:[#allocation5 + $0x8] sm:$0xff]   ;;  %vm458_vm1 = vcmask 130048   ;;  %vm1103_vm4 = vcmask 261120  }
  0x1e   :  { %2765 = vmatpush3.bf16.xpose.msra.mxu0 %v3050_v0  ;;  %2771 = vmatpush3.bf16.xpose.msra.mxu1 %v3051_v1  ;;  %v3054_v3 = vld [vmem:[%s3830_s1] sm:$0xff]   ;;  %v3055_v6 = vld [vmem:[%s3830_s1 + $0x8] sm:$0xff]   ;;  %v3057_v7 = vld [vmem:[#allocation5] sm:$0xff]  }
  0x1f   :  { %2766 = vmatprep.mubr.bf16.mxu0 %v3281_v2  ;;  %2772 = vmatprep.mubr.bf16.mxu1 %v3281_v2  ;;  %v194_v9 = vld [vmem:[%s3836_s7 + $0x10] sm:$0xff]  ;;  %v192_v16 = vld [vmem:[%s3836_s7] sm:$0xff]  ;;  %v195_v17 = vld [vmem:[%s3836_s7 + $0x18] sm:$0xff] }
  0x20   :  { %2784 = vmatprep.subr.bf16.mxu1 %v3054_v3  ;;  %2776 = vmatprep.subr.bf16.mxu0 %v3056_v5  ;;  %v198_v10 = vld [vmem:[%s3837_s8 + $0x10] sm:$0xff]  ;;  %v196_v18 = vld [vmem:[%s3837_s8] sm:$0xff]  ;;  %v199_v20 = vld [vmem:[%s3837_s8 + $0x18] sm:$0xff] }
  0x21   :  { %v193_v23 = vld [vmem:[%s3836_s7 + $0x8] sm:$0xff]  ;;  %v3347_v51 = vld [vmem:[%s3834_s5 + $0x10] sm:$0xff]  ;;  %v3364_v61 = vld [vmem:[%s3834_s5 + $0x18] sm:$0xff] }
  0x22   :  { %v197_v24 = vld [vmem:[%s3837_s8 + $0x8] sm:$0xff]  ;;  %v3356_v55 = vld [vmem:[%s3835_s6 + $0x10] sm:$0xff]  ;;  %v3369_v63 = vld [vmem:[%s3834_s5] sm:$0xff] }
  0x23   :  { %v3374_v0 = vld [vmem:[%s3835_s6] sm:$0xff]  ;;  %v3379_v1 = vld [vmem:[%s3834_s5 + $0x8] sm:$0xff] }
  0x25   :  { %2767 = vmatmul.mubr.bf16.vlgmr.msra.gmra.mxu0 %v3291_v4  ;;  %2773 = vmatmul.mubr.bf16.vlgmr.msra.gmra.mxu1 %v3291_v4 }
  0x26   :  { %2777 = vmatpush3.bf16.xpose.msra.mxu0 %v3056_v5  ;;  %2785 = vmatpush3.bf16.xpose.msra.mxu1 %v3054_v3 }
  0x27   :  { %2786 = vmatprep.mubr.bf16.mxu1 %v3281_v2  ;;  %2790 = vmatprep.subr.bf16.mxu1 %v3055_v6 }
  0x28   :  { %2780 = vmatprep.mubr.bf16.mxu0 %v3281_v2  ;;  %2778 = vmatprep.subr.bf16.mxu0 %v3057_v7 }
  0x2d   :  { %2787 = vmatmul.mubr.bf16.vlgmr.msra.gmra.mxu1 %v3291_v4 }
  0x2e   :  { %2791 = vmatpush3.bf16.xpose.msra.mxu1 %v3055_v6  ;;  %2792 = vmatprep.mubr.bf16.mxu1 %v3281_v2  ;;  %v3384_v6 = vld [vmem:[%s3835_s6 + $0x18] sm:$0xff] }
  0x2f   :  { %2779 = vmatpush3.bf16.xpose.msra.mxu0 %v3057_v7  ;;  %2802 = vmatprep.subr.bf16.mxu1 %v3216_v8  ;;  %v3389_v7 = vld [vmem:[%s3835_s6 + $0x8] sm:$0xff] }
  0x30   :  { %2796 = vmatprep.subr.bf16.mxu0 %v3216_v8 }
  0x35   :  { %2793 = vmatmul.mubr.bf16.vlgmr.msra.gmra.mxu1 %v3291_v4 }
  0x36   :  { %2781 = vmatmul.mubr.bf16.vlgmr.msra.gmra.mxu0 %v3291_v4  ;;  %2804 = vmatprep.mubr.msk.bf16.mxu1 %vm3217_vm0, %v3216_v8 }
  0x37   :  { %2798 = vmatprep.mubr.msk.bf16.mxu0 %vm3217_vm0, %v3216_v8 }
  0xe5   :  { %v2768_v11 = vpop.f32.mrf.mxu0  ;;  %v2774_v13 = vpop.f32.mrf.mxu1 }
  0xe6   :  { %v202_v12 = vmul.f32 %v2768_v11, %v194_v9  ;;  %v206_v14 = vmul.f32 %v2774_v13, %v198_v10  ;;  %v220_v59 = vmul.f32 %v2768_v11, %v198_v10  ;;  %v216_v60 = vmul.f32 %v2774_v13, %v194_v9 }
  0xe7   :  { %v120_v15 = vpop.f32.mrf.mxu0  ;;  %v177_v19 = vpop.f32.mrf.mxu1 }
  0xe8   :  { %v210_v21 = vsub.f32 %v202_v12, %v206_v14  ;;  %v200_v25 = vmul.f32 %v192_v16, %v120_v15  ;;  %v218_v28 = vmul.f32 %v196_v18, %v120_v15  ;;  %v204_v29 = vmul.f32 %v196_v18, %v177_v19 }
  0xe9   :  { %v2769_v22 = vpop.f32.mrf.mxu0  ;;  %v2775_v27 = vpop.f32.mrf.mxu1  ;;  %v214_v30 = vmul.f32 %v192_v16, %v177_v19  ;;  %v224_v14 = vadd.f32 %v220_v59, %v216_v60 }
  0xea   :  { %v203_v26 = vmul.f32 %v2769_v22, %v195_v17  ;;  %v207_v31 = vmul.f32 %v2775_v27, %v199_v20  ;;  %v208_v40 = vsub.f32 %v200_v25, %v204_v29  ;;  %v221_v53 = vmul.f32 %v2769_v22, %v199_v20 }
  0xeb   :  { %v123_v32 = vpop.f32.mrf.mxu0  ;;  %v180_v35 = vpop.f32.mrf.mxu1  ;;  %v222_v41 = vadd.f32 %v218_v28, %v214_v30  ;;  %v217_v54 = vmul.f32 %v2775_v27, %v195_v17 }
  0xec   :  { %v201_v33 = vmul.f32 %v193_v23, %v123_v32  ;;  %v219_v34 = vmul.f32 %v197_v24, %v123_v32  ;;  %v211_v36 = vsub.f32 %v203_v26, %v207_v31  ;;  %v205_v37 = vmul.f32 %v197_v24, %v180_v35 }
  0xed   :  { %v215_v38 = vmul.f32 %v193_v23, %v180_v35  ;;  %v3334_v39 = vpop.f32.mrf.mxu1  ;;  %v225_v5 = vadd.f32 %v221_v53, %v217_v54 }
  0xee   :  { %v209_v42 = vsub.f32 %v201_v33, %v205_v37  ;;  %v3336_v45 = vpack.c.bf16 %v211_v36, %v210_v21  ;;  %v428_v57 = vmul.f32 %v3334_v39, %v3347_v51  ;;  %v446_v35 = vmul.f32 %v3334_v39, %v3356_v55 }
  0xef   :  { %v223_v43 = vadd.f32 %v219_v34, %v215_v38  ;;  %v354_v44 = vpop.f32.mrf.mxu1  ;;  %v227_v24 = vpack.c.bf16 %v225_v5, %v224_v14 }
  0xf0   :  { %v212_v47 = vpack.c.bf16 %v209_v42, %v208_v40  ;;  %v426_v15 = vmul.f32 %v354_v44, %v3369_v63  ;;  %v444_v16 = vmul.f32 %v354_v44, %v3374_v0 }
  0xf1   :  { %v226_v46 = vpack.c.bf16 %v223_v43, %v222_v41  ;;  %v2789_v48 = vpop.f32.mrf.mxu1  ;;  %v3409_v34 = vsel %vm458_vm1, %v227_v24, 0 }
  0xf2   :  { %v3342_v50 = vsel %vm458_vm1, %v212_v47, 0  ;;  %v429_v11 = vmul.f32 %v2789_v48, %v3364_v61  ;;  %v447_v32 = vmul.f32 %v2789_v48, %v3384_v6 }
  0xf3   :  { %v3339_v49 = vsel %vm458_vm1, %v226_v46, 0  ;;  %v357_v52 = vpop.f32.mrf.mxu1  ;;  %2803 = vmatpush3.bf16.xpose.msra.mxu1 %v3342_v50  ;;  %v295_v46 = vlaneseq }
  0xf4   :  { %2797 = vmatpush3.bf16.xpose.msra.mxu0 %v3339_v49  ;;  %2814 = vmatprep.subr.bf16.mxu1 %v3216_v8  ;;  %v427_v17 = vmul.f32 %v357_v52, %v3379_v1  ;;  %v445_v19 = vmul.f32 %v357_v52, %v3389_v7 }
  0xf5   :  { %2808 = vmatprep.subr.bf16.mxu0 %v3216_v8  ;;  %v2794_v56 = vpop.f32.mrf.mxu1  ;;  %v296_v47 = vshrl.u32 %v295_v46, 7  ;;  %v299_v48 = vand.u32 127, %v295_v46 }
  0xf6   :  { %v432_v58 = vmul.f32 %v2794_v56, %v3356_v55  ;;  %v442_v33 = vmul.f32 %v2794_v56, %v3347_v51  ;;  %v2782_v40 = vpop.f32.mrf.mxu0  ;;  %v3218_v56 = vmov -1e+30  }
  0xf7   :  { %v411_v62 = vpop.f32.mrf.mxu1  ;;  %vm300_vm2 = vcmp.ge.s32.totalorder %v296_v47, %v299_v48  ;;  %v297_v52 = vadd.s32 8, %v296_v47 }
  0xf8   :  { %v436_v3 = vsub.f32 %v428_v57, %v432_v58  ;;  %v430_v9 = vmul.f32 %v411_v62, %v3374_v0  ;;  %v440_v12 = vmul.f32 %v411_v62, %v3369_v63  ;;  %v450_v37 = vadd.f32 %v446_v35, %v442_v33  ;;  %v278_v41 = vpop.f32.mrf.mxu0 }
  0xf9   :  { %v2795_v10 = vpop.f32.mrf.mxu1  ;;  %v3429_v57 = vsel %vm300_vm2, 0.0, %v3218_v56  ;;  %vm301_vm3 = vcmp.ge.s32.totalorder %v297_v52, %v299_v48 }
  0xfa   :  { %v433_v13 = vmul.f32 %v2795_v10, %v3384_v6  ;;  %v434_v23 = vsub.f32 %v426_v15, %v430_v9  ;;  %v448_v25 = vadd.f32 %v444_v16, %v440_v12  ;;  %v443_v29 = vmul.f32 %v2795_v10, %v3364_v61  ;;  %v2783_v42 = vpop.f32.mrf.mxu0 }
  0xfb   :  { %v414_v18 = vpop.f32.mrf.mxu1  ;;  %v3422_v43 = vpack.c.bf16 %v2783_v42, %v2782_v40  ;;  %v3432_v9 = vsel %vm301_vm3, 0.0, %v3218_v56  ;;  %v3058_v40 = vld [vmem:[%s3830_s1 + $0x10] sm:$0xff]  }
  0xfc   :  { %v437_v20 = vsub.f32 %v429_v11, %v433_v13  ;;  %v431_v21 = vmul.f32 %v414_v18, %v3389_v7  ;;  %v441_v22 = vmul.f32 %v414_v18, %v3379_v1  ;;  %v451_v36 = vadd.f32 %v447_v32, %v443_v29  ;;  %v281_v44 = vpop.f32.mrf.mxu0 }
  0xfd   :  { %v3424_v39 = vpack.c.bf16 %v281_v44, %v278_v41  ;;  %v3445_v41 = vsel %vm458_vm1, %v3336_v45, 0 }
  0xfe   :  { %v3401_v26 = vpack.c.bf16 %v437_v20, %v436_v3  ;;  %v435_v27 = vsub.f32 %v427_v17, %v431_v21  ;;  %v449_v28 = vadd.f32 %v445_v19, %v441_v22  ;;  %v453_v38 = vpack.c.bf16 %v451_v36, %v450_v37 }
 0x100   :  { %v438_v30 = vpack.c.bf16 %v435_v27, %v434_v23  ;;  %v452_v31 = vpack.c.bf16 %v449_v28, %v448_v25 }
 0x102   :  { %2799 = vmatmul.mubr.msk.bf16.vlgmr.msra.gmra.mxu0 %vm458_vm1, %v452_v31  ;;  %2805 = vmatmul.mubr.msk.bf16.vlgmr.msra.gmra.mxu1 %vm458_vm1, %v438_v30 }
 0x103   :  { %2815 = vmatpush3.bf16.xpose.msra.mxu1 %v3409_v34  ;;  %2816 = vmatprep.mubr.msk.bf16.mxu1 %vm3217_vm0, %v3216_v8 }
 0x104   :  { %2826 = vmatprep.subr.bf16.mxu1 %v3216_v8  ;;  %2810 = vmatprep.mubr.msk.bf16.mxu0 %vm3217_vm0, %v3216_v8 }
 0x105   :  { %2809 = vmatpush3.bf16.msra.mxu0 %v3424_v39 }
 0x106   :  { %2820 = vmatprep.subr.bf16.mxu0 %v3216_v8 }
 0x10a   :  { %2817 = vmatmul.mubr.msk.bf16.vlgmr.msra.gmra.mxu1 %vm458_vm1, %v453_v38 }
 0x10b   :  { %2828 = vmatprep.mubr.msk.bf16.mxu1 %vm3217_vm0, %v3216_v8  ;;  %2827 = vmatpush3.bf16.msra.mxu1 %v3422_v43 }
 0x1c2   :  { %v499_v53 = vpop.f32.mrf.mxu0  ;;  %v546_v54 = vpop.f32.mrf.mxu1 }
 0x1c3   :  { %v547_v58 = vadd.f32 %v546_v54, %v499_v53 }
 0x1c4   :  { %v2800_v59 = vpop.f32.mrf.mxu0  ;;  %v2806_v60 = vpop.f32.mrf.mxu1 }
 0x1c5   :  { %v553_v62 = vadd.f32 %v547_v58, %v3429_v57 }
 0x1c6   :  { %v502_v3 = vpop.f32.mrf.mxu0  ;;  %v549_v5 = vpop.f32.mrf.mxu1 }
 0x1c7   :  { %v550_v10 = vadd.f32 %v549_v5, %v502_v3  ;;  %v555_v11 = vsel %vm458_vm1, %v553_v62, -inf }
 0x1c8   :  { %v2801_v12 = vpop.f32.mrf.mxu0  ;;  %556 = vmax.xlane.f32.xlu0 %v555_v11  ;;  %v2807_v13 = vpop.f32.mrf.mxu1 }
 0x1c9   :  { %v554_v14 = vadd.f32 %v550_v10, %v3432_v9 }
 0x1ca   :  { %v663_v15 = vpop.f32.mrf.mxu1 }
 0x1cb   :  { %v558_v16 = vsel %vm458_vm1, %v554_v14, -inf }
 0x1cc   :  { %559 = vmax.xlane.f32.xlu0 %v558_v16  ;;  %v2818_v17 = vpop.f32.mrf.mxu1 }
 0x1ce   :  { %v666_v18 = vpop.f32.mrf.mxu1 }
 0x1d0   :  { %v2819_v19 = vpop.f32.mrf.mxu1 }
 0x251   :  { %v557_v20 = vpop.xlane.xlu0 %556 }
 0x252   :  { %v561_v21 = vsub.f32 %v553_v62, %v557_v20 }
 0x254   :  { %v563_v22 = vmul.f32 1.442695, %v561_v21 }
 0x255   :  { %v560_v23 = vpop.xlane.xlu0 %559 }
 0x256   :  { %3072 = vpow2.f32 %v563_v22  ;;  %v562_v24 = vsub.f32 %v554_v14, %v560_v23 }
 0x258   :  { %v565_v25 = vmul.f32 1.442695, %v562_v24 }
 0x25a   :  { %3074 = vpow2.f32 %v565_v25 }
 0x263   :  { %v3073_v27 = vpop.eup %3072 }
 0x264   :  { %v567_v28 = vsel %vm458_vm1, %v3073_v27, 0.0 }
 0x265   :  { %568 = vadd.xlane.f32.xlu1 %v567_v28 }
 0x267   :  { %v3075_v29 = vpop.eup %3074 }
 0x268   :  { %v570_v30 = vsel %vm458_vm1, %v3075_v29, 0.0 }
 0x269   :  { %571 = vadd.xlane.f32.xlu1 %v570_v30 }
 0x2ee   :  { %v569_v31 = vpop.xlane.xlu1 %568 }
 0x2ef   :  { %3076 = vrcp.f32 %v569_v31 }
 0x2f2   :  { %v572_v32 = vpop.xlane.xlu1 %571 }
 0x2f3   :  { %3078 = vrcp.f32 %v572_v32 }
 0x2fc   :  { %v3077_v33 = vpop.eup %3076 }
 0x2fd   :  { %v575_v36 = vmul.f32 %v3077_v33, %v3073_v27 }
 0x300   :  { %v3079_v35 = vpop.eup %3078 }
 0x301   :  { %v576_v37 = vmul.f32 %v3079_v35, %v3075_v29 }
 0x303   :  { %v577_v38 = vpack.c.bf16 %v576_v37, %v575_v36 }
 0x305   :  { %2811 = vmatmul.mubr.msk.bf16.vlgmr.msra.gmra.mxu0 %vm458_vm1, %v577_v38 }
 0x306   :  { %2821 = vmatpush3.bf16.xpose.msra.mxu0 %v3445_v41  ;;  %2822 = vmatprep.mubr.msk.bf16.mxu0 %vm3217_vm0, %v3216_v8 }
 0x307   :  { %2832 = vmatprep.subr.bf16.mxu0 %v3058_v40 }
 0x30d   :  { %2823 = vmatmul.mubr.msk.bf16.vlgmr.msra.gmra.mxu0 %vm458_vm1, %v3401_v26 }
 0x30e   :  { %2833 = vmatpush3.bf16.xpose.msra.mxu0 %v3058_v40  ;;  %2834 = vmatprep.mubr.bf16.mxu0 %v3281_v2 }
 0x30f   :  { %2844 = vmatprep.subr.bf16.mxu0 %v3216_v8 }
 0x315   :  { %2835 = vmatmul.mubr.bf16.vlgmr.msra.gmra.mxu0 %v3291_v4 }
 0x316   :  { %2845 = vmatpush3.bf16.xpose.msra.mxu0 %v3339_v49  ;;  %2846 = vmatprep.mubr.msk.bf16.mxu0 %vm3217_vm0, %v3216_v8 }
 0x317   :  { %2856 = vmatprep.subr.bf16.mxu0 %v3216_v8 }
 0x3c5   :  { %v3459_v45 = vpop.f32.mrf.mxu0 }
 0x3c7   :  { %v2812_v42 = vpop.f32.mrf.mxu0 }
 0x3c9   :  { %v3461_v44 = vpop.f32.mrf.mxu0 }
 0x3ca   :  { %v622_v26 = vpack.c.bf16 %v3461_v44, %v3459_v45  ;;  %v3063_v45 = vld [vmem:[%s3833_s4 + $0x10] sm:$0xff]  }
 0x3cb   :  { %v2813_v46 = vpop.f32.mrf.mxu0 }
 0x3cd   :  { %v710_v47 = vpop.f32.mrf.mxu0 }
 0x3ce   :  { %v711_v48 = vadd.f32 %v710_v47, %v663_v15 }
 0x3cf   :  { %v2824_v52 = vpop.f32.mrf.mxu0 }
 0x3d0   :  { %v717_v53 = vadd.f32 %v711_v48, %v3429_v57 }
 0x3d1   :  { %v713_v54 = vpop.f32.mrf.mxu0 }
 0x3d2   :  { %v714_v56 = vadd.f32 %v713_v54, %v666_v18  ;;  %v719_v58 = vsel %vm458_vm1, %v717_v53, -inf  ;;  %v3059_v18 = vld [vmem:[%s3830_s1 + $0x18] sm:$0xff]  }
 0x3d3   :  { %v2825_v59 = vpop.f32.mrf.mxu0  ;;  %720 = vmax.xlane.f32.xlu0 %v719_v58  ;;  %2838 = vmatprep.subr.bf16.mxu1 %v3059_v18 }
 0x3d4   :  { %v718_v60 = vadd.f32 %v714_v56, %v3432_v9 }
 0x3d5   :  { %v2836_v27 = vpop.f32.mrf.mxu0 }
 0x3d6   :  { %v722_v62 = vsel %vm458_vm1, %v718_v60, -inf  ;;  %v903_v35 = vmul.f32 %v2836_v27, %v3347_v51  ;;  %v921_v36 = vmul.f32 %v2836_v27, %v3356_v55 }
 0x3d7   :  { %723 = vmax.xlane.f32.xlu1 %v722_v62  ;;  %v829_v30 = vpop.f32.mrf.mxu0 }
 0x3d9   :  { %v2837_v37 = vpop.f32.mrf.mxu0 }
 0x3da   :  { %v904_v58 = vmul.f32 %v2837_v37, %v3364_v61  ;;  %v922_v59 = vmul.f32 %v2837_v37, %v3384_v6 }
 0x3db   :  { %v832_v52 = vpop.f32.mrf.mxu0 }
 0x45c   :  { %v721_v3 = vpop.xlane.xlu0 %720 }
 0x45d   :  { %v725_v5 = vsub.f32 %v717_v53, %v721_v3  ;;  %v901_v3 = vmul.f32 %v829_v30, %v3369_v63 }
 0x45f   :  { %v727_v10 = vmul.f32 1.442695, %v725_v5  ;;  %v919_v5 = vmul.f32 %v829_v30, %v3374_v0 }
 0x460   :  { %v724_v11 = vpop.xlane.xlu1 %723 }
 0x461   :  { %3080 = vpow2.f32 %v727_v10  ;;  %v726_v12 = vsub.f32 %v718_v60, %v724_v11  ;;  %v902_v10 = vmul.f32 %v832_v52, %v3379_v1  ;;  %v920_v11 = vmul.f32 %v832_v52, %v3389_v7 }
 0x463   :  { %v729_v13 = vmul.f32 1.442695, %v726_v12 }
 0x465   :  { %3082 = vpow2.f32 %v729_v13 }
 0x46e   :  { %v3081_v14 = vpop.eup %3080 }
 0x46f   :  { %v731_v15 = vsel %vm458_vm1, %v3081_v14, 0.0 }
 0x470   :  { %732 = vadd.xlane.f32.xlu0 %v731_v15 }
 0x472   :  { %v3083_v16 = vpop.eup %3082 }
 0x473   :  { %v734_v17 = vsel %vm458_vm1, %v3083_v16, 0.0 }
 0x474   :  { %735 = vadd.xlane.f32.xlu1 %v734_v17 }
 0x4f9   :  { %v733_v19 = vpop.xlane.xlu0 %732 }
 0x4fa   :  { %3084 = vrcp.f32 %v733_v19 }
 0x4fd   :  { %v736_v20 = vpop.xlane.xlu1 %735 }
 0x4fe   :  { %3086 = vrcp.f32 %v736_v20 }
 0x507   :  { %v3085_v21 = vpop.eup %3084 }
 0x508   :  { %v739_v23 = vmul.f32 %v3085_v21, %v3081_v14 }
 0x50b   :  { %v3087_v22 = vpop.eup %3086 }
 0x50c   :  { %v740_v24 = vmul.f32 %v3087_v22, %v3083_v16 }
 0x50e   :  { %v741_v25 = vpack.c.bf16 %v740_v24, %v739_v23 }
 0x510   :  { %2829 = vmatmul.mubr.msk.bf16.vlgmr.msra.gmra.mxu1 %vm458_vm1, %v741_v25 }
 0x511   :  { %2839 = vmatpush3.bf16.xpose.msra.mxu1 %v3059_v18  ;;  %2840 = vmatprep.mubr.bf16.mxu1 %v3281_v2 }
 0x512   :  { %2850 = vmatprep.subr.bf16.mxu1 %v3216_v8 }
 0x518   :  { %2841 = vmatmul.mubr.bf16.vlgmr.msra.gmra.mxu1 %v3291_v4 }
 0x519   :  { %2851 = vmatpush3.bf16.xpose.msra.mxu1 %v3342_v50  ;;  %2852 = vmatprep.mubr.msk.bf16.mxu1 %vm3217_vm0, %v3216_v8 }
 0x51a   :  { %2862 = vmatprep.subr.bf16.mxu1 %v3216_v8 }
 0x5d0   :  { %v3482_v28 = vpop.f32.mrf.mxu1 }
 0x5d2   :  { %v2830_v29 = vpop.f32.mrf.mxu1 }
 0x5d4   :  { %v3484_v31 = vpop.f32.mrf.mxu1 }
 0x5d5   :  { %v786_v32 = vpack.c.bf16 %v3484_v31, %v3482_v28  ;;  %v3065_v28 = vld [vmem:[%s3830_s1 + $0x20] sm:$0xff]  }
 0x5d6   :  { %v2831_v33 = vpop.f32.mrf.mxu1 }
 0x5d8   :  { %v2842_v38 = vpop.f32.mrf.mxu1 }
 0x5d9   :  { %v907_v40 = vmul.f32 %v2842_v38, %v3356_v55  ;;  %v917_v42 = vmul.f32 %v2842_v38, %v3347_v51 }
 0x5da   :  { %v886_v46 = vpop.f32.mrf.mxu1 }
 0x5db   :  { %v911_v47 = vsub.f32 %v903_v35, %v907_v40  ;;  %v3492_v48 = vadd.f32 %v921_v36, %v917_v42  ;;  %v905_v53 = vmul.f32 %v886_v46, %v3374_v0  ;;  %v915_v54 = vmul.f32 %v886_v46, %v3369_v63 }
 0x5dc   :  { %v2843_v56 = vpop.f32.mrf.mxu1 }
 0x5dd   :  { %v908_v60 = vmul.f32 %v2843_v56, %v3384_v6  ;;  %v918_v62 = vmul.f32 %v2843_v56, %v3364_v61  ;;  %v909_v17 = vsub.f32 %v901_v3, %v905_v53  ;;  %v923_v18 = vadd.f32 %v919_v5, %v915_v54 }
 0x5de   :  { %v889_v12 = vpop.f32.mrf.mxu1 }
 0x5df   :  { %v912_v13 = vsub.f32 %v904_v58, %v908_v60  ;;  %v3504_v14 = vadd.f32 %v922_v59, %v918_v62  ;;  %v906_v15 = vmul.f32 %v889_v12, %v3389_v7  ;;  %v916_v16 = vmul.f32 %v889_v12, %v3379_v1 }
 0x5e1   :  { %v3508_v19 = vpack.c.bf16 %v912_v13, %v911_v47  ;;  %v928_v20 = vpack.c.bf16 %v3504_v14, %v3492_v48  ;;  %v910_v21 = vsub.f32 %v902_v10, %v906_v15  ;;  %v924_v22 = vadd.f32 %v920_v11, %v916_v16  ;;  %v3062_v11 = vld [vmem:[%s3833_s4 + $0x18] sm:$0xff]  }
 0x5e3   :  { %v913_v23 = vpack.c.bf16 %v910_v21, %v909_v17  ;;  %v927_v24 = vpack.c.bf16 %v924_v22, %v923_v18  ;;  %v3533_v21 = vld [vmem:[%s3833_s4 + $0x8] sm:$0xff]  }
 0x5e5   :  { %2847 = vmatmul.mubr.msk.bf16.vlgmr.msra.gmra.mxu0 %vm458_vm1, %v927_v24  ;;  %2853 = vmatmul.mubr.msk.bf16.vlgmr.msra.gmra.mxu1 %vm458_vm1, %v913_v23  ;;  %v3540_v23 = vld [vmem:[%s3833_s4] sm:$0xff]  }
 0x5e6   :  { %2857 = vmatpush3.bf16.msra.mxu0 %v3424_v39  ;;  %2858 = vmatprep.mubr.msk.bf16.mxu0 %vm3217_vm0, %v3216_v8 }
 0x5e7   :  { %2870 = vmatprep.subr.bf16.mxu0 %v3216_v8  ;;  %2866 = vmatprep.mubr.msk.bf16.mxu1 %vm3217_vm0, %v3216_v8 }
 0x5e8   :  { %2863 = vmatpush3.bf16.msra.mxu1 %v3062_v11 }
 0x5e9   :  { %2864 = vmatprep.subr.bf16.mxu1 %v3216_v8 }
 0x5ec   :  { %2865 = vmatpush3.bf16.msra.mxu1 %v3063_v45 }
 0x5ed   :  { %2878 = vmatprep.subr.bf16.mxu1 %v3216_v8 }
 0x6a5   :  { %v970_v25 = vpop.f32.mrf.mxu0  ;;  %v1014_v27 = vpop.f32.mrf.mxu1 }
 0x6a6   :  { %v1015_v29 = vadd.f32 %v1014_v27, %v970_v25 }
 0x6a7   :  { %v2848_v30 = vpop.f32.mrf.mxu0  ;;  %v2854_v33 = vpop.f32.mrf.mxu1 }
 0x6a8   :  { %v1021_v35 = vadd.f32 %v1015_v29, %v3429_v57 }
 0x6a9   :  { %v973_v36 = vpop.f32.mrf.mxu0  ;;  %v1017_v37 = vpop.f32.mrf.mxu1 }
 0x6aa   :  { %v1018_v38 = vadd.f32 %v1017_v37, %v973_v36  ;;  %v1023_v40 = vsel %vm458_vm1, %v1021_v35, -inf }
 0x6ab   :  { %v2849_v42 = vpop.f32.mrf.mxu0  ;;  %1024 = vmax.xlane.f32.xlu0 %v1023_v40  ;;  %v2855_v46 = vpop.f32.mrf.mxu1 }
 0x6ac   :  { %v1022_v47 = vadd.f32 %v1018_v38, %v3432_v9 }
 0x6ae   :  { %v1026_v52 = vsel %vm458_vm1, %v1022_v47, -inf }
 0x6af   :  { %1027 = vmax.xlane.f32.xlu1 %v1026_v52 }
 0x734   :  { %v1025_v53 = vpop.xlane.xlu0 %1024 }
 0x735   :  { %v1029_v54 = vsub.f32 %v1021_v35, %v1025_v53 }
 0x737   :  { %v1031_v56 = vmul.f32 1.442695, %v1029_v54 }
 0x738   :  { %v1028_v58 = vpop.xlane.xlu1 %1027 }
 0x739   :  { %3088 = vpow2.f32 %v1031_v56  ;;  %v1030_v59 = vsub.f32 %v1022_v47, %v1028_v58 }
 0x73b   :  { %v1033_v60 = vmul.f32 1.442695, %v1030_v59 }
 0x73d   :  { %3090 = vpow2.f32 %v1033_v60 }
 0x746   :  { %v3089_v62 = vpop.eup %3088 }
 0x747   :  { %v1035_v3 = vsel %vm458_vm1, %v3089_v62, 0.0 }
 0x748   :  { %1036 = vadd.xlane.f32.xlu0 %v1035_v3 }
 0x74a   :  { %v3091_v5 = vpop.eup %3090 }
 0x74b   :  { %v1038_v10 = vsel %vm458_vm1, %v3091_v5, 0.0 }
 0x74c   :  { %1039 = vadd.xlane.f32.xlu1 %v1038_v10 }
 0x7d1   :  { %v1037_v12 = vpop.xlane.xlu0 %1036 }
 0x7d2   :  { %3092 = vrcp.f32 %v1037_v12 }
 0x7d5   :  { %v1040_v13 = vpop.xlane.xlu1 %1039 }
 0x7d6   :  { %3094 = vrcp.f32 %v1040_v13 }
 0x7df   :  { %v3093_v15 = vpop.eup %3092 }
 0x7e0   :  { %v1043_v17 = vmul.f32 %v3093_v15, %v3089_v62 }
 0x7e3   :  { %v3095_v16 = vpop.eup %3094 }
 0x7e4   :  { %v1044_v18 = vmul.f32 %v3095_v16, %v3091_v5 }
 0x7e6   :  { %v1045_v22 = vpack.c.bf16 %v1044_v18, %v1043_v17 }
 0x7e8   :  { %2859 = vmatmul.mubr.msk.bf16.vlgmr.msra.gmra.mxu0 %vm458_vm1, %v1045_v22 }
 0x7e9   :  { %2871 = vmatpush3.bf16.msra.mxu0 %v3533_v21  ;;  %2874 = vmatprep.mubr.msk.bf16.mxu0 %vm3217_vm0, %v3216_v8 }
 0x7ea   :  { %2872 = vmatprep.subr.bf16.mxu0 %v3216_v8 }
 0x7ed   :  { %2873 = vmatpush3.bf16.msra.mxu0 %v3540_v23 }
 0x7ee   :  { %2884 = vmatprep.subr.bf16.mxu0 %v3216_v8 }
 0x7f0   :  { %2875 = vmatmul.mubr.msk.bf16.vlgmr.msra.gmra.mxu0 %vm1103_vm4, %v622_v26 }
 0x7f1   :  { %2885 = vmatpush3.bf16.xpose.msra.mxu0 %v3445_v41  ;;  %2886 = vmatprep.mubr.msk.bf16.mxu0 %vm3217_vm0, %v3216_v8 }
 0x7f2   :  { %2896 = vmatprep.subr.bf16.mxu0 %v3216_v8 }
 0x7f8   :  { %2887 = vmatmul.mubr.msk.bf16.vlgmr.msra.gmra.mxu0 %vm458_vm1, %v3508_v19 }
 0x7f9   :  { %2897 = vmatpush3.bf16.msra.mxu0 %v3062_v11  ;;  %2900 = vmatprep.mubr.msk.bf16.mxu0 %vm3217_vm0, %v3216_v8 }
 0x7fa   :  { %2898 = vmatprep.subr.bf16.mxu0 %v3216_v8 }
 0x7fd   :  { %2899 = vmatpush3.bf16.msra.mxu0 %v3063_v45 }
 0x7fe   :  { %2912 = vmatprep.subr.bf16.mxu0 %v3065_v28 }
 0x8a8   :  { %v1083_v44 = vpop.f32.mrf.mxu0 }
 0x8aa   :  { %v2860_v26 = vpop.f32.mrf.mxu0 }
 0x8ac   :  { %v1086_v24 = vpop.f32.mrf.mxu0 }
 0x8ad   :  { %v1090_v25 = vpack.c.bf16 %v1086_v24, %v1083_v44 }
 0x8ae   :  { %v2861_v27 = vpop.f32.mrf.mxu0 }
 0x8af   :  { %2867 = vmatmul.mubr.msk.bf16.vlgmr.msra.gmra.mxu1 %vm1103_vm4, %v1090_v25  ;;  %v3064_v27 = vld [vmem:[%s3830_s1 + $0x28] sm:$0xff]  }
 0x8b0   :  { %2879 = vmatpush3.bf16.xpose.msra.mxu1 %v3409_v34  ;;  %v3566_v19 = vpop.f32.mrf.mxu0  ;;  %2880 = vmatprep.mubr.msk.bf16.mxu1 %vm3217_vm0, %v3216_v8 }
 0x8b1   :  { %2890 = vmatprep.subr.bf16.mxu1 %v3216_v8 }
 0x8b2   :  { %v2876_v29 = vpop.f32.mrf.mxu0 }
 0x8b4   :  { %v3571_v30 = vpop.f32.mrf.mxu0 }
 0x8b6   :  { %v2877_v33 = vpop.f32.mrf.mxu0 }
 0x8b7   :  { %2881 = vmatmul.mubr.msk.bf16.vlgmr.msra.gmra.mxu1 %vm458_vm1, %v928_v20 }
 0x8b8   :  { %2891 = vmatpush3.bf16.msra.mxu1 %v3422_v43  ;;  %v1285_v35 = vpop.f32.mrf.mxu0  ;;  %2892 = vmatprep.mubr.msk.bf16.mxu1 %vm3217_vm0, %v3216_v8 }
 0x8b9   :  { %2904 = vmatprep.subr.bf16.mxu1 %v3216_v8 }
 0x8ba   :  { %v2888_v36 = vpop.f32.mrf.mxu0 }
 0x8bc   :  { %v1288_v37 = vpop.f32.mrf.mxu0 }
 0x8be   :  { %v2889_v38 = vpop.f32.mrf.mxu0 }
 0x96f   :  { %v3581_v40 = vpop.f32.mrf.mxu1 }
 0x971   :  { %v2868_v42 = vpop.f32.mrf.mxu1 }
 0x973   :  { %v3583_v46 = vpop.f32.mrf.mxu1 }
 0x975   :  { %v2869_v47 = vpop.f32.mrf.mxu1 }
 0x977   :  { %v1241_v48 = vpop.f32.mrf.mxu1 }
 0x978   :  { %v1286_v14 = vadd.f32 %v1285_v35, %v1241_v48 }
 0x979   :  { %v2882_v20 = vpop.f32.mrf.mxu1 }
 0x97a   :  { %v1292_v52 = vadd.f32 %v1286_v14, %v3429_v57 }
 0x97b   :  { %v1244_v53 = vpop.f32.mrf.mxu1 }
 0x97c   :  { %v1289_v54 = vadd.f32 %v1288_v37, %v1244_v53  ;;  %v1294_v56 = vsel %vm458_vm1, %v1292_v52, -inf }
 0x97d   :  { %1295 = vmax.xlane.f32.xlu0 %v1294_v56  ;;  %v2883_v58 = vpop.f32.mrf.mxu1 }
 0x97e   :  { %v1293_v59 = vadd.f32 %v1289_v54, %v3432_v9 }
 0x980   :  { %v1297_v60 = vsel %vm458_vm1, %v1293_v59, -inf }
 0x981   :  { %1298 = vmax.xlane.f32.xlu1 %v1297_v60 }
 0xa06   :  { %v1296_v62 = vpop.xlane.xlu0 %1295 }
 0xa07   :  { %v1300_v3 = vsub.f32 %v1292_v52, %v1296_v62 }
 0xa09   :  { %v1302_v5 = vmul.f32 1.442695, %v1300_v3 }
 0xa0a   :  { %v1299_v10 = vpop.xlane.xlu1 %1298 }
 0xa0b   :  { %3096 = vpow2.f32 %v1302_v5  ;;  %v1301_v11 = vsub.f32 %v1293_v59, %v1299_v10 }
 0xa0d   :  { %v1304_v12 = vmul.f32 1.442695, %v1301_v11 }
 0xa0f   :  { %3098 = vpow2.f32 %v1304_v12 }
 0xa18   :  { %v3097_v13 = vpop.eup %3096 }
 0xa19   :  { %v1306_v15 = vsel %vm458_vm1, %v3097_v13, 0.0 }
 0xa1a   :  { %1307 = vadd.xlane.f32.xlu0 %v1306_v15 }
 0xa1c   :  { %v3099_v16 = vpop.eup %3098 }
 0xa1d   :  { %v1309_v17 = vsel %vm458_vm1, %v3099_v16, 0.0 }
 0xa1e   :  { %1310 = vadd.xlane.f32.xlu1 %v1309_v17 }
 0xaa3   :  { %v1308_v18 = vpop.xlane.xlu0 %1307 }
 0xaa4   :  { %3100 = vrcp.f32 %v1308_v18 }
 0xaa7   :  { %v1311_v22 = vpop.xlane.xlu1 %1310 }
 0xaa8   :  { %3102 = vrcp.f32 %v1311_v22 }
 0xab1   :  { %v3101_v45 = vpop.eup %3100 }
 0xab2   :  { %v1314_v26 = vmul.f32 %v3101_v45, %v3097_v13 }
 0xab5   :  { %v3103_v44 = vpop.eup %3102 }
 0xab6   :  { %v1315_v24 = vmul.f32 %v3103_v44, %v3099_v16 }
 0xab8   :  { %v1316_v25 = vpack.c.bf16 %v1315_v24, %v1314_v26 }
 0xaba   :  { %2893 = vmatmul.mubr.msk.bf16.vlgmr.msra.gmra.mxu1 %vm458_vm1, %v1316_v25 }
 0xabb   :  { %2905 = vmatpush3.bf16.msra.mxu1 %v3533_v21  ;;  %2908 = vmatprep.mubr.msk.bf16.mxu1 %vm3217_vm0, %v3216_v8 }
 0xabc   :  { %2906 = vmatprep.subr.bf16.mxu1 %v3216_v8 }
 0xabf   :  { %2907 = vmatpush3.bf16.msra.mxu1 %v3540_v23 }
 0xac0   :  { %2918 = vmatprep.subr.bf16.mxu1 %v3064_v27 }
 0xac2   :  { %2909 = vmatmul.mubr.msk.bf16.vlgmr.msra.gmra.mxu1 %vm1103_vm4, %v786_v32 }
 0xac3   :  { %2919 = vmatpush3.bf16.xpose.msra.mxu1 %v3064_v27  ;;  %2920 = vmatprep.mubr.bf16.mxu1 %v3281_v2 }
 0xac4   :  { %2930 = vmatprep.subr.bf16.mxu1 %v3216_v8 }
 0xaca   :  { %2921 = vmatmul.mubr.bf16.vlgmr.msra.gmra.mxu1 %v3291_v4 }
 0xacb   :  { %2931 = vmatpush3.bf16.xpose.msra.mxu1 %v3342_v50  ;;  %2932 = vmatprep.mubr.msk.bf16.mxu1 %vm3217_vm0, %v3216_v8 }
 0xacc   :  { %2942 = vmatprep.subr.bf16.mxu1 %v3216_v8 }
 0xb7a   :  { %v1354_v31 = vpop.f32.mrf.mxu1 }
 0xb7c   :  { %v2894_v32 = vpop.f32.mrf.mxu1 }
 0xb7e   :  { %v1357_v21 = vpop.f32.mrf.mxu1 }
 0xb7f   :  { %v1361_v23 = vpack.c.bf16 %v1357_v21, %v1354_v31 }
 0xb80   :  { %v2895_v29 = vpop.f32.mrf.mxu1 }
 0xb81   :  { %2901 = vmatmul.mubr.msk.bf16.vlgmr.msra.gmra.mxu0 %vm1103_vm4, %v1361_v23 }
 0xb82   :  { %2913 = vmatpush3.bf16.xpose.msra.mxu0 %v3065_v28  ;;  %v3615_v33 = vpop.f32.mrf.mxu1  ;;  %2914 = vmatprep.mubr.bf16.mxu0 %v3281_v2 }
 0xb83   :  { %2924 = vmatprep.subr.bf16.mxu0 %v3216_v8 }
 0xb84   :  { %v2910_v35 = vpop.f32.mrf.mxu1 }
 0xb86   :  { %v3619_v36 = vpop.f32.mrf.mxu1 }
 0xb88   :  { %v2911_v37 = vpop.f32.mrf.mxu1 }
 0xb89   :  { %2915 = vmatmul.mubr.bf16.vlgmr.msra.gmra.mxu0 %v3291_v4 }
 0xb8a   :  { %2925 = vmatpush3.bf16.xpose.msra.mxu0 %v3339_v49  ;;  %2926 = vmatprep.mubr.msk.bf16.mxu0 %vm3217_vm0, %v3216_v8  ;;  %v2922_v38 = vpop.f32.mrf.mxu1 }
 0xb8b   :  { %2936 = vmatprep.subr.bf16.mxu0 %v3216_v8  ;;  %v1570_v20 = vmul.f32 %v2922_v38, %v3356_v55  ;;  %v1580_v52 = vmul.f32 %v2922_v38, %v3347_v51 }
 0xb8c   :  { %v1549_v2 = vpop.f32.mrf.mxu1 }
 0xb8d   :  { %v1578_v15 = vmul.f32 %v1549_v2, %v3369_v63 }
 0xb8e   :  { %v2923_v4 = vpop.f32.mrf.mxu1 }
 0xb8f   :  { %v1571_v11 = vmul.f32 %v2923_v4, %v3384_v6  ;;  %v1581_v12 = vmul.f32 %v2923_v4, %v3364_v61 }
 0xb90   :  { %v1552_v62 = vpop.f32.mrf.mxu1 }
 0xb91   :  { %v1569_v16 = vmul.f32 %v1552_v62, %v3389_v7  ;;  %v1579_v17 = vmul.f32 %v1552_v62, %v3379_v1 }
 0xc41   :  { %v3626_v42 = vpop.f32.mrf.mxu0 }
 0xc43   :  { %v2902_v47 = vpop.f32.mrf.mxu0 }
 0xc45   :  { %v3628_v48 = vpop.f32.mrf.mxu0 }
 0xc47   :  { %v2903_v14 = vpop.f32.mrf.mxu0 }
 0xc49   :  { %v2916_v53 = vpop.f32.mrf.mxu0 }
 0xc4a   :  { %v1566_v54 = vmul.f32 %v2916_v53, %v3347_v51  ;;  %v1584_v56 = vmul.f32 %v2916_v53, %v3356_v55  ;;  %v1568_v55 = vmul.f32 %v1549_v2, %v3374_v0 }
 0xc4b   :  { %v1492_v58 = vpop.f32.mrf.mxu0 }
 0xc4c   :  { %v1574_v59 = vsub.f32 %v1566_v54, %v1570_v20  ;;  %v3634_v60 = vadd.f32 %v1584_v56, %v1580_v52  ;;  %v1564_v3 = vmul.f32 %v1492_v58, %v3369_v63  ;;  %v1582_v5 = vmul.f32 %v1492_v58, %v3374_v0 }
 0xc4d   :  { %v2917_v10 = vpop.f32.mrf.mxu0 }
 0xc4e   :  { %v1567_v13 = vmul.f32 %v2917_v10, %v3364_v61  ;;  %v1585_v51 = vmul.f32 %v2917_v10, %v3384_v6  ;;  %v1572_v24 = vsub.f32 %v1564_v3, %v1568_v55  ;;  %v1586_v61 = vadd.f32 %v1582_v5, %v1578_v15  ;;  %v3066_v5 = vld [vmem:[%s3833_s4 + $0x28] sm:$0xff]  }
 0xc4f   :  { %v1495_v18 = vpop.f32.mrf.mxu0 }
 0xc50   :  { %v1575_v22 = vsub.f32 %v1567_v13, %v1571_v11  ;;  %v3646_v45 = vadd.f32 %v1585_v51, %v1581_v12  ;;  %v1565_v44 = vmul.f32 %v1495_v18, %v3379_v1  ;;  %v1583_v26 = vmul.f32 %v1495_v18, %v3389_v7 }
 0xc52   :  { %v3650_v25 = vpack.c.bf16 %v1575_v22, %v1574_v59  ;;  %v1591_v0 = vpack.c.bf16 %v3646_v45, %v3634_v60  ;;  %v1573_v63 = vsub.f32 %v1565_v44, %v1569_v16  ;;  %v1587_v6 = vadd.f32 %v1583_v26, %v1579_v17  ;;  %v3067_v16 = vld [vmem:[%s3833_s4 + $0x20] sm:$0xff]  }
 0xc54   :  { %v1576_v27 = vpack.c.bf16 %v1573_v63, %v1572_v24  ;;  %v1590_v28 = vpack.c.bf16 %v1587_v6, %v1586_v61  ;;  %v1198_v63 = vadd.f32 %v3566_v19, %v3581_v40 }
 0xc56   :  { %2927 = vmatmul.mubr.msk.bf16.vlgmr.msra.gmra.mxu0 %vm458_vm1, %v1590_v28  ;;  %2933 = vmatmul.mubr.msk.bf16.vlgmr.msra.gmra.mxu1 %vm458_vm1, %v1576_v27 }
 0xc57   :  { %2937 = vmatpush3.bf16.msra.mxu0 %v3424_v39  ;;  %2938 = vmatprep.mubr.msk.bf16.mxu0 %vm3217_vm0, %v3216_v8 }
 0xc58   :  { %2950 = vmatprep.subr.bf16.mxu0 %v3216_v8  ;;  %2946 = vmatprep.mubr.msk.bf16.mxu1 %vm3217_vm0, %v3216_v8 }
 0xc59   :  { %2943 = vmatpush3.bf16.msra.mxu1 %v3066_v5 }
 0xc5a   :  { %2944 = vmatprep.subr.bf16.mxu1 %v3216_v8 }
 0xc5d   :  { %2945 = vmatpush3.bf16.msra.mxu1 %v3067_v16 }
 0xc5e   :  { %2956 = vmatprep.subr.bf16.mxu1 %v3216_v8 }
 0xd16   :  { %v1633_v1 = vpop.f32.mrf.mxu0  ;;  %v1677_v7 = vpop.f32.mrf.mxu1 }
 0xd17   :  { %v1678_v31 = vadd.f32 %v1677_v7, %v1633_v1  ;;  %v1201_v1 = vadd.f32 %v3571_v30, %v3583_v46 }
 0xd18   :  { %v2928_v32 = vpop.f32.mrf.mxu0  ;;  %v2934_v21 = vpop.f32.mrf.mxu1 }
 0xd19   :  { %v1684_v23 = vadd.f32 %v1678_v31, %v3429_v57 }
 0xd1a   :  { %v1636_v29 = vpop.f32.mrf.mxu0  ;;  %v1680_v35 = vpop.f32.mrf.mxu1 }
 0xd1b   :  { %v1681_v37 = vadd.f32 %v1680_v35, %v1636_v29  ;;  %v1686_v38 = vsel %vm458_vm1, %v1684_v23, -inf }
 0xd1c   :  { %v2929_v47 = vpop.f32.mrf.mxu0  ;;  %1687 = vmax.xlane.f32.xlu0 %v1686_v38  ;;  %v2935_v2 = vpop.f32.mrf.mxu1 }
 0xd1d   :  { %v1685_v14 = vadd.f32 %v1681_v37, %v3432_v9 }
 0xd1f   :  { %v1689_v20 = vsel %vm458_vm1, %v1685_v14, -inf }
 0xd20   :  { %1690 = vmax.xlane.f32.xlu1 %v1689_v20 }
 0xda5   :  { %v1688_v52 = vpop.xlane.xlu0 %1687 }
 0xda6   :  { %v1692_v4 = vsub.f32 %v1684_v23, %v1688_v52 }
 0xda8   :  { %v1694_v53 = vmul.f32 1.442695, %v1692_v4 }
 0xda9   :  { %v1691_v54 = vpop.xlane.xlu1 %1690 }
 0xdaa   :  { %3104 = vpow2.f32 %v1694_v53  ;;  %v1693_v56 = vsub.f32 %v1685_v14, %v1691_v54 }
 0xdac   :  { %v1696_v58 = vmul.f32 1.442695, %v1693_v56 }
 0xdae   :  { %3106 = vpow2.f32 %v1696_v58  ;;  %v3068_v58 = vld [vmem:[%s3830_s1 + $0x30] sm:$0xff]  }
 0xdb7   :  { %v3105_v59 = vpop.eup %3104 }
 0xdb8   :  { %v1698_v60 = vsel %vm458_vm1, %v3105_v59, 0.0 }
 0xdb9   :  { %1699 = vadd.xlane.f32.xlu0 %v1698_v60 }
 0xdbb   :  { %v3107_v62 = vpop.eup %3106 }
 0xdbc   :  { %v1701_v3 = vsel %vm458_vm1, %v3107_v62, 0.0 }
 0xdbd   :  { %1702 = vadd.xlane.f32.xlu1 %v1701_v3 }
 0xe42   :  { %v1700_v10 = vpop.xlane.xlu0 %1699 }
 0xe43   :  { %3108 = vrcp.f32 %v1700_v10 }
 0xe46   :  { %v1703_v11 = vpop.xlane.xlu1 %1702 }
 0xe47   :  { %3110 = vrcp.f32 %v1703_v11 }
 0xe50   :  { %v3109_v12 = vpop.eup %3108 }
 0xe51   :  { %v1706_v51 = vmul.f32 %v3109_v12, %v3105_v59  ;;  %v3136_v12 = vld [vmem:[%s3829_s0] sm:$0xff]  }
 0xe54   :  { %v3111_v13 = vpop.eup %3110 }
 0xe55   :  { %v1707_v55 = vmul.f32 %v3111_v13, %v3107_v62  ;;  %v3137_v13 = vld [vmem:[%s3829_s0 + $0x8] sm:$0xff]  }
 0xe57   :  { %v1708_v15 = vpack.c.bf16 %v1707_v55, %v1706_v51  ;;  %v3069_v51 = vld [vmem:[%s3830_s1 + $0x38] sm:$0xff]  }
 0xe59   :  { %2939 = vmatmul.mubr.msk.bf16.vlgmr.msra.gmra.mxu0 %vm458_vm1, %v1708_v15 }
 0xe5a   :  { %2951 = vmatpush3.bf16.xpose.msra.mxu0 %v3409_v34  ;;  %2952 = vmatprep.mubr.msk.bf16.mxu0 %vm3217_vm0, %v3216_v8 }
 0xe5b   :  { %2962 = vmatprep.subr.bf16.mxu0 %v3216_v8 }
 0xe61   :  { %2953 = vmatmul.mubr.msk.bf16.vlgmr.msra.gmra.mxu0 %vm458_vm1, %v1591_v0 }
 0xe62   :  { %2963 = vmatpush3.bf16.msra.mxu0 %v3422_v43  ;;  %2964 = vmatprep.mubr.msk.bf16.mxu0 %vm3217_vm0, %v3216_v8 }
 0xe63   :  { %2976 = vmatprep.subr.bf16.mxu0 %v3068_v58 }
 0xf19   :  { %v1746_v17 = vpop.f32.mrf.mxu0 }
 0xf1b   :  { %v2940_v18 = vpop.f32.mrf.mxu0 }
 0xf1d   :  { %v1749_v22 = vpop.f32.mrf.mxu0 }
 0xf1e   :  { %v1753_v45 = vpack.c.bf16 %v1749_v22, %v1746_v17 }
 0xf1f   :  { %v2941_v44 = vpop.f32.mrf.mxu0 }
 0xf20   :  { %2947 = vmatmul.mubr.msk.bf16.vlgmr.msra.gmra.mxu1 %vm1103_vm4, %v1753_v45 }
 0xf21   :  { %2957 = vmatpush3.bf16.xpose.msra.mxu1 %v3445_v41  ;;  %v1849_v26 = vpop.f32.mrf.mxu0  ;;  %2958 = vmatprep.mubr.msk.bf16.mxu1 %vm3217_vm0, %v3216_v8 }
 0xf22   :  { %2968 = vmatprep.subr.bf16.mxu1 %v3216_v8 }
 0xf23   :  { %v2954_v24 = vpop.f32.mrf.mxu0 }
 0xf24   :  { %v1447_v24 = vadd.f32 %v3619_v36, %v3628_v48 }
 0xf25   :  { %v1852_v61 = vpop.f32.mrf.mxu0 }
 0xf27   :  { %v2955_v0 = vpop.f32.mrf.mxu0 }
 0xf28   :  { %2959 = vmatmul.mubr.msk.bf16.vlgmr.msra.gmra.mxu1 %vm458_vm1, %v3650_v25 }
 0xf29   :  { %2969 = vmatpush3.bf16.msra.mxu1 %v3066_v5  ;;  %2972 = vmatprep.mubr.msk.bf16.mxu1 %vm3217_vm0, %v3216_v8 }
 0xf2a   :  { %2970 = vmatprep.subr.bf16.mxu1 %v3216_v8 }
 0xf2d   :  { %2971 = vmatpush3.bf16.msra.mxu1 %v3067_v16 }
 0xf2e   :  { %2982 = vmatprep.subr.bf16.mxu1 %v3069_v51 }
 0xfe0   :  { %v1803_v6 = vpop.f32.mrf.mxu1 }
 0xfe1   :  { %v3697_v27 = vadd.f32 %v1803_v6, %v1198_v63  ;;  %v3138_v6 = vld [vmem:[%s3834_s5 + $0x10] sm:$0xff] }
 0xfe2   :  { %v2948_v28 = vpop.f32.mrf.mxu1 }
 0xfe4   :  { %v1806_v7 = vpop.f32.mrf.mxu1 }
 0xfe5   :  { %v3701_v31 = vadd.f32 %v1806_v7, %v1201_v1 }
 0xfe6   :  { %v2949_v25 = vpop.f32.mrf.mxu1 }
 0xfe8   :  { %v1893_v32 = vpop.f32.mrf.mxu1 }
 0xfe9   :  { %v1894_v21 = vadd.f32 %v1893_v32, %v1849_v26 }
 0xfea   :  { %v2960_v23 = vpop.f32.mrf.mxu1 }
 0xfeb   :  { %v1900_v29 = vadd.f32 %v1894_v21, %v3429_v57 }
 0xfec   :  { %v1896_v35 = vpop.f32.mrf.mxu1 }
 0xfed   :  { %v1897_v37 = vadd.f32 %v1896_v35, %v1852_v61  ;;  %v1902_v19 = vsel %vm458_vm1, %v1900_v29, -inf }
 0xfee   :  { %1903 = vmax.xlane.f32.xlu0 %v1902_v19  ;;  %v2961_v40 = vpop.f32.mrf.mxu1 }
 0xfef   :  { %v1901_v38 = vadd.f32 %v1897_v37, %v3432_v9  ;;  %v3141_v37 = vld [vmem:[%s3834_s5] sm:$0xff] }
 0xff1   :  { %v1905_v47 = vsel %vm458_vm1, %v1901_v38, -inf }
 0xff2   :  { %1906 = vmax.xlane.f32.xlu1 %v1905_v47 }
0x1077   :  { %v1904_v30 = vpop.xlane.xlu0 %1903 }
0x1078   :  { %v1908_v46 = vsub.f32 %v1900_v29, %v1904_v30  ;;  %v3140_v29 = vld [vmem:[%s3835_s6] sm:$0xff]  ;;  %v3143_v30 = vld [vmem:[%s3835_s6 + $0x18] sm:$0xff] }
0x107a   :  { %v1910_v2 = vmul.f32 1.442695, %v1908_v46 }
0x107b   :  { %v1907_v14 = vpop.xlane.xlu1 %1906 }
0x107c   :  { %3112 = vpow2.f32 %v1910_v2  ;;  %v1909_v20 = vsub.f32 %v1901_v38, %v1907_v14  ;;  %v3142_v38 = vld [vmem:[%s3834_s5 + $0x18] sm:$0xff] }
0x107e   :  { %v1912_v52 = vmul.f32 1.442695, %v1909_v20 }
0x1080   :  { %3114 = vpow2.f32 %v1912_v52 }
0x1089   :  { %v3113_v4 = vpop.eup %3112 }
0x108a   :  { %v1914_v53 = vsel %vm458_vm1, %v3113_v4, 0.0 }
0x108b   :  { %1915 = vadd.xlane.f32.xlu0 %v1914_v53 }
0x108d   :  { %v3115_v54 = vpop.eup %3114 }
0x108e   :  { %v1917_v56 = vsel %vm458_vm1, %v3115_v54, 0.0 }
0x108f   :  { %1918 = vadd.xlane.f32.xlu1 %v1917_v56 }
0x1114   :  { %v1916_v59 = vpop.xlane.xlu0 %1915 }
0x1115   :  { %3116 = vrcp.f32 %v1916_v59 }
0x1118   :  { %v1919_v60 = vpop.xlane.xlu1 %1918 }
0x1119   :  { %3118 = vrcp.f32 %v1919_v60 }
0x1122   :  { %v3117_v62 = vpop.eup %3116 }
0x1123   :  { %v1922_v5 = vmul.f32 %v3117_v62, %v3113_v4  ;;  %v3144_v4 = vld [vmem:[%s3834_s5 + $0x8] sm:$0xff] }
0x1126   :  { %v3119_v3 = vpop.eup %3118 }
0x1127   :  { %v1923_v10 = vmul.f32 %v3119_v3, %v3115_v54  ;;  %v3145_v54 = vld [vmem:[%s3835_s6 + $0x8] sm:$0xff] }
0x1129   :  { %v1924_v11 = vpack.c.bf16 %v1923_v10, %v1922_v5 }
0x112b   :  { %2965 = vmatmul.mubr.msk.bf16.vlgmr.msra.gmra.mxu0 %vm458_vm1, %v1924_v11 }
0x112c   :  { %2977 = vmatpush3.bf16.xpose.msra.mxu0 %v3068_v58  ;;  %2978 = vmatprep.mubr.bf16.mxu0 %v3136_v12 }
0x112d   :  { %2988 = vmatprep.subr.bf16.mxu0 %v3216_v8 }
0x1133   :  { %2979 = vmatmul.mubr.bf16.vlgmr.msra.gmra.mxu0 %v3137_v13 }
0x1134   :  { %2989 = vmatpush3.bf16.xpose.msra.mxu0 %v3339_v49  ;;  %2990 = vmatprep.mubr.msk.bf16.mxu0 %vm3217_vm0, %v3216_v8  ;;  %v1444_v49 = vadd.f32 %v3615_v33, %v3626_v42  ;;  %v3139_v33 = vld [vmem:[%s3835_s6 + $0x10] sm:$0xff] }
0x1135   :  { %3000 = vmatprep.subr.bf16.mxu0 %v3216_v8 }
0x11eb   :  { %v1962_v55 = vpop.f32.mrf.mxu0 }
0x11ed   :  { %v2966_v15 = vpop.f32.mrf.mxu0 }
0x11ef   :  { %v1965_v16 = vpop.f32.mrf.mxu0 }
0x11f0   :  { %v1969_v17 = vpack.c.bf16 %v1965_v16, %v1962_v55 }
0x11f1   :  { %v2967_v18 = vpop.f32.mrf.mxu0 }
0x11f2   :  { %2973 = vmatmul.mubr.msk.bf16.vlgmr.msra.gmra.mxu1 %vm1103_vm4, %v1969_v17 }
0x11f3   :  { %2983 = vmatpush3.bf16.xpose.msra.mxu1 %v3069_v51  ;;  %2984 = vmatprep.mubr.bf16.mxu1 %v3136_v12  ;;  %v2980_v22 = vpop.f32.mrf.mxu0 }
0x11f4   :  { %2994 = vmatprep.subr.bf16.mxu1 %v3216_v8  ;;  %v2132_v28 = vmul.f32 %v3138_v6, %v2980_v22  ;;  %v2150_v42 = vmul.f32 %v3139_v33, %v2980_v22 }
0x11f5   :  { %v2058_v61 = vpop.f32.mrf.mxu0 }
0x11f6   :  { %v2130_v20 = vmul.f32 %v3141_v37, %v2058_v61  ;;  %v2148_v52 = vmul.f32 %v3140_v29, %v2058_v61 }
0x11f7   :  { %v2981_v1 = vpop.f32.mrf.mxu0 }
0x11f8   :  { %v2133_v47 = vmul.f32 %v3142_v38, %v2981_v1  ;;  %v2151_v46 = vmul.f32 %v3143_v30, %v2981_v1 }
0x11f9   :  { %v2061_v23 = vpop.f32.mrf.mxu0 }
0x11fa   :  { %2985 = vmatmul.mubr.bf16.vlgmr.msra.gmra.mxu1 %v3137_v13  ;;  %v2131_v53 = vmul.f32 %v3144_v4, %v2061_v23  ;;  %v2149_v56 = vmul.f32 %v3145_v54, %v2061_v23 }
0x11fb   :  { %2995 = vmatpush3.bf16.xpose.msra.mxu1 %v3342_v50  ;;  %2996 = vmatprep.mubr.msk.bf16.mxu1 %vm3217_vm0, %v3216_v8 }
0x11fc   :  { %3006 = vmatprep.subr.bf16.mxu1 %v3216_v8 }
0x12b2   :  { %v2007_v45 = vpop.f32.mrf.mxu1 }
0x12b3   :  { %v3735_v44 = vadd.f32 %v2007_v45, %v1444_v49 }
0x12b4   :  { %v2974_v26 = vpop.f32.mrf.mxu1 }
0x12b6   :  { %v2010_v0 = vpop.f32.mrf.mxu1 }
0x12b7   :  { %v3739_v63 = vadd.f32 %v2010_v0, %v1447_v24 }
0x12b8   :  { %v2975_v50 = vpop.f32.mrf.mxu1 }
0x12ba   :  { %v2986_v7 = vpop.f32.mrf.mxu1 }
0x12bb   :  { %v2136_v25 = vmul.f32 %v3139_v33, %v2986_v7  ;;  %v2146_v32 = vmul.f32 %v3138_v6, %v2986_v7 }
0x12bc   :  { %v2115_v36 = vpop.f32.mrf.mxu1 }
0x12bd   :  { %v2140_v48 = vsub.f32 %v2132_v28, %v2136_v25  ;;  %v3747_v21 = vadd.f32 %v2150_v42, %v2146_v32  ;;  %v2134_v35 = vmul.f32 %v3140_v29, %v2115_v36  ;;  %v2144_v19 = vmul.f32 %v3141_v37, %v2115_v36  ;;  %v3070_v29 = vld [vmem:[%s3833_s4 + $0x38] sm:$0xff]  }
0x12be   :  { %v2987_v40 = vpop.f32.mrf.mxu1 }
0x12bf   :  { %v2137_v2 = vmul.f32 %v3143_v30, %v2987_v40  ;;  %v2147_v14 = vmul.f32 %v3142_v38, %v2987_v40  ;;  %v2138_v5 = vsub.f32 %v2130_v20, %v2134_v35  ;;  %v2152_v10 = vadd.f32 %v2148_v52, %v2144_v19 }
0x12c0   :  { %v2118_v58 = vpop.f32.mrf.mxu1 }
0x12c1   :  { %v2141_v59 = vsub.f32 %v2133_v47, %v2137_v2  ;;  %v3767_v60 = vadd.f32 %v2151_v46, %v2147_v14  ;;  %v2135_v62 = vmul.f32 %v3145_v54, %v2118_v58  ;;  %v2145_v3 = vmul.f32 %v3144_v4, %v2118_v58  ;;  %v3071_v46 = vld [vmem:[%s3833_s4 + $0x30] sm:$0xff]   ;;  %s3219_s4 = smov [#allocation7]  }
0x12c2   :  { %s2591_s28 = sshll.u32 %s3219_s4, 4  ;;  %s2592_s28 = int_to_ptr.vmem [resolvable:$true] %s2591_s28 }
0x12c3   :  { %v3769_v11 = vpack.c.bf16 %v2141_v59, %v2140_v48  ;;  %v2157_v12 = vpack.c.bf16 %v3767_v60, %v3747_v21  ;;  %v2139_v13 = vsub.f32 %v2131_v53, %v2135_v62  ;;  %v2153_v51 = vadd.f32 %v2149_v56, %v2145_v3  ;;  %s3186_s29 = scalar_lea.vmem %s2592_s28, 512  ;;  %p3191_p11 = scmp.lt.s32.totalorder %s2592_s28, %s2592_s28 }
0x12c4   :  { %p3187_p10 = scmp.ne.s32.totalorder %s2592_s28, %s3186_s29  ;;  %p3192_p12 = scmp.lt.s32.totalorder %s3186_s29, %s3186_s29 }
0x12c5   :  { %v2142_v55 = vpack.c.bf16 %v2139_v13, %v2138_v5  ;;  %v2156_v15 = vpack.c.bf16 %v2153_v51, %v2152_v10 }
0x12c6   :  { %p3193_p13 = por %p3192_p12, %p3191_p11 }
0x12c7   :  { %2991 = vmatmul.mubr.msk.bf16.vlgmr.msra.gmra.mxu0 %vm458_vm1, %v2156_v15  ;;  %2997 = vmatmul.mubr.msk.bf16.vlgmr.msra.gmra.mxu1 %vm458_vm1, %v2142_v55 }
0x12c8   :  { %3001 = vmatpush3.bf16.msra.mxu0 %v3424_v39  ;;  %3002 = vmatprep.mubr.msk.bf16.mxu0 %vm3217_vm0, %v3216_v8  ;;  %p3194_p0 = pnand %p3193_p13, %p3187_p10 }
0x12c9   :  { %3014 = vmatprep.subr.bf16.mxu0 %v3216_v8  ;;  %3010 = vmatprep.mubr.msk.bf16.mxu1 %vm3217_vm0, %v3216_v8 }
0x12ca   :  { %3007 = vmatpush3.bf16.msra.mxu1 %v3070_v29 }
0x12cb   :  { %3008 = vmatprep.subr.bf16.mxu1 %v3216_v8 }
0x12ce   :  { %3009 = vmatpush3.bf16.msra.mxu1 %v3071_v46 }
0x12cf   :  { %3020 = vmatprep.subr.bf16.mxu1 %v3216_v8 }
0x1387   :  { %v2199_v16 = vpop.f32.mrf.mxu0  ;;  %v2243_v17 = vpop.f32.mrf.mxu1 }
0x1388   :  { %v2244_v18 = vadd.f32 %v2243_v17, %v2199_v16 }
0x1389   :  { %v2992_v49 = vpop.f32.mrf.mxu0  ;;  %v2998_v22 = vpop.f32.mrf.mxu1 }
0x138a   :  { %v2250_v45 = vadd.f32 %v2244_v18, %v3429_v57 }
0x138b   :  { %v2202_v26 = vpop.f32.mrf.mxu0  ;;  %v2246_v24 = vpop.f32.mrf.mxu1 }
0x138c   :  { %v2247_v61 = vadd.f32 %v2246_v24, %v2202_v26  ;;  %v2252_v39 = vsel %vm458_vm1, %v2250_v45, -inf }
0x138d   :  { %v2993_v0 = vpop.f32.mrf.mxu0  ;;  %2253 = vmax.xlane.f32.xlu0 %v2252_v39  ;;  %v2999_v50 = vpop.f32.mrf.mxu1 }
0x138e   :  { %v2251_v6 = vadd.f32 %v2247_v61, %v3432_v9 }
0x1390   :  { %v2255_v28 = vsel %vm458_vm1, %v2251_v6, -inf }
0x1391   :  { %2256 = vmax.xlane.f32.xlu1 %v2255_v28 }
0x1416   :  { %v2254_v33 = vpop.xlane.xlu0 %2253 }
0x1417   :  { %v2258_v42 = vsub.f32 %v2250_v45, %v2254_v33 }
0x1419   :  { %v2260_v1 = vmul.f32 1.442695, %v2258_v42 }
0x141a   :  { %v2257_v7 = vpop.xlane.xlu1 %2256 }
0x141b   :  { %3120 = vpow2.f32 %v2260_v1  ;;  %v2259_v25 = vsub.f32 %v2251_v6, %v2257_v7 }
0x141d   :  { %v2262_v32 = vmul.f32 1.442695, %v2259_v25 }
0x141f   :  { %3122 = vpow2.f32 %v2262_v32 }
0x1428   :  { %v3121_v36 = vpop.eup %3120 }
0x1429   :  { %v2264_v48 = vsel %vm458_vm1, %v3121_v36, 0.0 }
0x142a   :  { %2265 = vadd.xlane.f32.xlu0 %v2264_v48 }
0x142c   :  { %v3123_v21 = vpop.eup %3122 }
0x142d   :  { %v2267_v23 = vsel %vm458_vm1, %v3123_v21, 0.0 }
0x142e   :  { %2268 = vadd.xlane.f32.xlu1 %v2267_v23 }
0x14b3   :  { %v2266_v35 = vpop.xlane.xlu0 %2265 }
0x14b4   :  { %3124 = vrcp.f32 %v2266_v35 }
0x14b7   :  { %v2269_v37 = vpop.xlane.xlu1 %2268 }
0x14b8   :  { %3126 = vrcp.f32 %v2269_v37 }
0x14c1   :  { %v3125_v19 = vpop.eup %3124 }
0x14c2   :  { %v2272_v38 = vmul.f32 %v3125_v19, %v3121_v36 }
0x14c5   :  { %v3127_v40 = vpop.eup %3126 }
0x14c6   :  { %v2273_v47 = vmul.f32 %v3127_v40, %v3123_v21 }
0x14c8   :  { %v2274_v30 = vpack.c.bf16 %v2273_v47, %v2272_v38 }
0x14ca   :  { %3003 = vmatmul.mubr.msk.bf16.vlgmr.msra.gmra.mxu0 %vm458_vm1, %v2274_v30 }
0x14cb   :  { %3015 = vmatpush3.bf16.xpose.msra.mxu0 %v3409_v34  ;;  %3016 = vmatprep.mubr.msk.bf16.mxu0 %vm3217_vm0, %v3216_v8 }
0x14cc   :  { %3026 = vmatprep.subr.bf16.mxu0 %v3216_v8 }
0x14d2   :  { %3017 = vmatmul.mubr.msk.bf16.vlgmr.msra.gmra.mxu0 %vm458_vm1, %v2157_v12 }
0x14d3   :  { %3027 = vmatpush3.bf16.msra.mxu0 %v3422_v43  ;;  %3028 = vmatprep.mubr.msk.bf16.mxu0 %vm3217_vm0, %v3216_v8 }
0x158a   :  { %v2312_v34 = vpop.f32.mrf.mxu0 }
0x158c   :  { %v3004_v2 = vpop.f32.mrf.mxu0 }
0x158e   :  { %v2315_v14 = vpop.f32.mrf.mxu0 }
0x158f   :  { %v2319_v20 = vpack.c.bf16 %v2315_v14, %v2312_v34 }
0x1590   :  { %v3005_v52 = vpop.f32.mrf.mxu0 }
0x1591   :  { %3011 = vmatmul.mubr.msk.bf16.vlgmr.msra.gmra.mxu1 %vm1103_vm4, %v2319_v20 }
0x1592   :  { %3021 = vmatpush3.bf16.xpose.msra.mxu1 %v3445_v41  ;;  %v2415_v43 = vpop.f32.mrf.mxu0  ;;  %3022 = vmatprep.mubr.msk.bf16.mxu1 %vm3217_vm0, %v3216_v8 }
0x1593   :  { %3032 = vmatprep.subr.bf16.mxu1 %v3216_v8 }
0x1594   :  { %v3018_v4 = vpop.f32.mrf.mxu0 }
0x1596   :  { %v2418_v53 = vpop.f32.mrf.mxu0 }
0x1598   :  { %v3019_v54 = vpop.f32.mrf.mxu0 }
0x1599   :  { %3023 = vmatmul.mubr.msk.bf16.vlgmr.msra.gmra.mxu1 %vm458_vm1, %v3769_v11 }
0x159a   :  { %3033 = vmatpush3.bf16.msra.mxu1 %v3070_v29  ;;  %3036 = vmatprep.mubr.msk.bf16.mxu1 %vm3217_vm0, %v3216_v8 }
0x159b   :  { %3034 = vmatprep.subr.bf16.mxu1 %v3216_v8 }
0x159e   :  { %3035 = vmatpush3.bf16.msra.mxu1 %v3071_v46 }
0x1651   :  { %v2369_v41 = vpop.f32.mrf.mxu1 }
0x1652   :  { %v2376_v56 = vadd.f32 %v2369_v41, %v3697_v27 }
0x1653   :  { %v3012_v58 = vpop.f32.mrf.mxu1 }
0x1654   :  { %2582 = vst [vmem:[#allocation7] sm:$0xff] %v2376_v56 }
0x1655   :  { %v2372_v59 = vpop.f32.mrf.mxu1 }
0x1656   :  { %v2377_v60 = vadd.f32 %v2372_v59, %v3701_v31 }
0x1657   :  { %v3013_v62 = vpop.f32.mrf.mxu1 }
0x1658   :  { %2583 = vst [vmem:[#allocation7 + $0x8] sm:$0xff] %v2377_v60 }
0x1659   :  { %v2459_v3 = vpop.f32.mrf.mxu1 }
0x165a   :  { %v2460_v5 = vadd.f32 %v2459_v3, %v2415_v43 }
0x165b   :  { %v3024_v10 = vpop.f32.mrf.mxu1 }
0x165c   :  { %v2466_v11 = vadd.f32 %v2460_v5, %v3429_v57 }
0x165d   :  { %v2462_v12 = vpop.f32.mrf.mxu1 }
0x165e   :  { %v2463_v13 = vadd.f32 %v2462_v12, %v2418_v53  ;;  %v2468_v8 = vsel %vm458_vm1, %v2466_v11, -inf }
0x165f   :  { %2469 = vmax.xlane.f32.xlu0 %v2468_v8  ;;  %v3025_v51 = vpop.f32.mrf.mxu1 }
0x1660   :  { %v2467_v27 = vadd.f32 %v2463_v13, %v3432_v9 }
0x1662   :  { %v2471_v55 = vsel %vm458_vm1, %v2467_v27, -inf }
0x1663   :  { %2472 = vmax.xlane.f32.xlu1 %v2471_v55 }
0x16e8   :  { %v2470_v15 = vpop.xlane.xlu0 %2469 }
0x16e9   :  { %v2474_v31 = vsub.f32 %v2466_v11, %v2470_v15 }
0x16eb   :  { %v2476_v16 = vmul.f32 1.442695, %v2474_v31 }
0x16ec   :  { %v2473_v17 = vpop.xlane.xlu1 %2472 }
0x16ed   :  { %3128 = vpow2.f32 %v2476_v16  ;;  %v2475_v18 = vsub.f32 %v2467_v27, %v2473_v17 }
0x16ef   :  { %v2478_v49 = vmul.f32 1.442695, %v2475_v18 }
0x16f1   :  { %3130 = vpow2.f32 %v2478_v49 }
0x16fa   :  { %v3129_v57 = vpop.eup %3128 }
0x16fb   :  { %v2480_v22 = vsel %vm458_vm1, %v3129_v57, 0.0 }
0x16fc   :  { %2481 = vadd.xlane.f32.xlu0 %v2480_v22 }
0x16fe   :  { %v3131_v45 = vpop.eup %3130 }
0x16ff   :  { %v2483_v26 = vsel %vm458_vm1, %v3131_v45, 0.0 }
0x1700   :  { %2484 = vadd.xlane.f32.xlu1 %v2483_v26 }
0x1785   :  { %v2482_v9 = vpop.xlane.xlu0 %2481 }
0x1786   :  { %3132 = vrcp.f32 %v2482_v9 }
0x1789   :  { %v2485_v24 = vpop.xlane.xlu1 %2484 }
0x178a   :  { %3134 = vrcp.f32 %v2485_v24 }
0x1793   :  { %v3133_v61 = vpop.eup %3132 }
0x1794   :  { %v2488_v0 = vmul.f32 %v3133_v61, %v3129_v57 }
0x1797   :  { %v3135_v39 = vpop.eup %3134 }
0x1798   :  { %v2489_v50 = vmul.f32 %v3135_v39, %v3131_v45 }
0x179a   :  { %v2490_v6 = vpack.c.bf16 %v2489_v50, %v2488_v0 }
0x179c   :  { %3029 = vmatmul.mubr.msk.bf16.vlgmr.msra.gmra.mxu0 %vm458_vm1, %v2490_v6 }
0x185c   :  { %v2528_v28 = vpop.f32.mrf.mxu0 }
0x185e   :  { %v3030_v33 = vpop.f32.mrf.mxu0 }
0x1860   :  { %v2531_v42 = vpop.f32.mrf.mxu0 }
0x1861   :  { %v2535_v1 = vpack.c.bf16 %v2531_v42, %v2528_v28 }
0x1862   :  { %v3031_v7 = vpop.f32.mrf.mxu0 }
0x1863   :  { %3037 = vmatmul.mubr.msk.bf16.vlgmr.msra.gmra.mxu1 %vm1103_vm4, %v2535_v1 }
0x1923   :  { %v2573_v25 = vpop.f32.mrf.mxu1 }
0x1924   :  { %v2580_v32 = vadd.f32 %v2573_v25, %v3735_v44 }
0x1925   :  { %v3038_v36 = vpop.f32.mrf.mxu1 }
0x1926   :  { %2584 = vst [vmem:[#allocation7 + $0x10] sm:$0xff] %v2580_v32 }
0x1927   :  { %v2576_v48 = vpop.f32.mrf.mxu1 }
0x1928   :  { %v2581_v21 = vadd.f32 %v2576_v48, %v3739_v63 }
0x1929   :  { %v3039_v23 = vpop.f32.mrf.mxu1 }
0x192a   :  { %2585 = vst [vmem:[#allocation7 + $0x18] sm:$0xff] %v2581_v21 }
0x192b   :  { %3197 = shalt.err (!%p3194_p0)
}
0x192c   :  { %s3220_s30 = smov 128   ;;  %s3221_s10 = smov 8  }
0x192d   :  { %2597 = dma.vmem_to_hbm [thread:$0]  %s2592_s28, 512, %s3838_s9, [#allocation4], %s3220_s30, %s3220_s30, %s3221_s10  }
0x192e   :  { %3210 = dma.done.wait [#allocation4], 512  }
0x192f   :  { %3211 = vsyncadd [#allocation4], 4294966784 }
0x1930   :  { %2601 = vsyncpa [#allocation3], 1 }
0x1931   :  { %2602 = vsyncpa [#allocation6], 1 }
0x1932   :  { %2603 = vsyncpa [#allocation4], 1 }

</bundles_post_ra>
